<compile_context>
chip_gen: v6e
topology: v6e:2x2x1
jax: 0.10.0
libtpu: 0.0.40
codegen_flags: <defaults>
</compile_context>

<pallas_src>
import functools

import jax
import jax.numpy as jnp
from jax import lax
from jax.experimental import pallas as pl
from jax.experimental.pallas import tpu as pltpu


def _upsample_kernel(x_ref, w_ref, p0_ref, p1_ref, o_ref, rhs_ref, acc_ref,
                     *, cin, c_f, th, wp, wd):
    """One (batch, row-tile) grid step.

    x_ref  : (1, 1, Cin, (th+3)*Wp)  zero-padded input rows, spatial flattened on lanes
    w_ref  : (Cout, 9*Cin)           weights; out-channels in (dx, dy, cf) order,
                                     contraction tap-major (t = 3*ky + kx, then ci)
    p0/p1  : (W, 2W)                 0/1 riffle matrices: p0[w, 2w] = 1, p1[w, 2w+1] = 1
    o_ref  : (1, c_f, 2*th, 2*W)     final pixel-shuffled output tile (dense stores)
    rhs_ref: (9*Cin, th*Wp)          im2col scratch (VMEM)
    acc_ref: (Cout, th*Wp)           f32 conv accumulator scratch (VMEM)
    """
    span = th * wp

    # --- im2col: 9 statically shifted copies of the padded tile -> scratch ---
    for t in range(9):
        ky, kx = divmod(t, 3)
        off = ky * wp + kx
        rhs_ref[t * cin:(t + 1) * cin, :] = x_ref[0, 0, :, off:off + span]

    # --- single big-K conv matmul: (Cout, 9*Cin) @ (9*Cin, th*Wp) ---
    acc_ref[...] = jnp.dot(w_ref[...], rhs_ref[...],
                           preferred_element_type=jnp.float32)

    p0 = p0_ref[...]
    p1 = p1_ref[...]

    # --- in-kernel PixelShuffle(2) ---
    # For each conv row r: interleave the dx=0 / dx=1 channel groups along the
    # lane axis (w -> 2w+dx) with two exact 0/1 matmuls, then write the two
    # pixel-shuffled output rows (2r, 2r+1) with dense 2W-wide stores.  The
    # pad columns of acc (lanes >= W within each row) are never read.
    for r in range(th):
        a = acc_ref[0:2 * c_f, r * wp:r * wp + wd]           # dx = 0 channels
        b = acc_ref[2 * c_f:4 * c_f, r * wp:r * wp + wd]     # dx = 1 channels
        rows = (jnp.dot(a, p0, preferred_element_type=jnp.float32)
                + jnp.dot(b, p1, preferred_element_type=jnp.float32))  # (2*c_f, 2W)
        o_ref[0, :, 2 * r, :] = rows[0:c_f, :].astype(o_ref.dtype)          # dy = 0
        o_ref[0, :, 2 * r + 1, :] = rows[c_f:2 * c_f, :].astype(o_ref.dtype)  # dy = 1


def _pick_row_tile(h, cin, wp, itemsize):
    """Largest row tile (divisor of h, multiple of 4) whose im2col scratch is small."""
    budget = 10 * 1024 * 1024  # keep im2col scratch well inside scoped VMEM (v7x safe)

    def fits(t):
        return 9 * cin * t * wp * itemsize <= budget

    if h <= 16 and fits(h):
        return h
    best = None
    for t in range(4, h, 4):              # 2*t must be a multiple of 8 (sublane rule)
        if h % t == 0 and t <= 32 and fits(t):
            best = t
    return best if best is not None else h  # fall back to whole image


def upsample_forward(x, weight):
    """x: (B, Cin, H, W); weight: (2*Cin, Cin, 3, 3). Returns (B, Cin//2, 2H, 2W)."""
    b, cin, h, wd = x.shape
    cout = weight.shape[0]
    assert weight.shape == (cout, cin, 3, 3)
    assert cout == 2 * cin and cout % 4 == 0, "PixelShuffle(2) needs Cout % 4 == 0"
    c_f = cout // 4

    wp = wd + 2                       # 1 left + 1 right zero pad
    itemsize = jnp.dtype(x.dtype).itemsize
    th = _pick_row_tile(h, cin, wp, itemsize)
    nt = h // th
    assert th * nt == h

    # Zero-pad: 1 top, 2 bottom (extra row keeps flattened tap slices in bounds;
    # its values only reach unused pad lanes), 1 left/right.  Row tiles overlap
    # by the 3-row halo and are materialized once (same cost class as the old
    # jnp.pad copy).  TODO(synk): replace with pl.ANY + manual halo DMA.
    x_pad = jnp.pad(x, ((0, 0), (0, 0), (1, 2), (1, 1)))
    if nt == 1:
        x_tiles = x_pad[:, None]
    else:
        x_tiles = jnp.stack(
            [x_pad[:, :, i * th:i * th + th + 3, :] for i in range(nt)], axis=1)
    x_tiles = x_tiles.reshape(b, nt, cin, (th + 3) * wp)

    # Weights: out-channels (cf, dy, dx) -> (dx, dy, cf) so the kernel's channel
    # groups slice contiguously; contraction ordered tap-major to match im2col.
    w_p = weight.reshape(c_f, 2, 2, cin, 3, 3).transpose(2, 1, 0, 3, 4, 5)
    w_p = w_p.reshape(cout, cin, 3, 3).transpose(0, 2, 3, 1).reshape(cout, 9 * cin)
    w_p = w_p.astype(x.dtype)

    # 0/1 riffle (perfect-shuffle) matrices: out[:, 2w + dx] = in_dx[:, w].
    col = jnp.arange(2 * wd)[None, :]
    row = jnp.arange(wd)[:, None]
    p0 = (col == 2 * row).astype(jnp.float32)
    p1 = (col == 2 * row + 1).astype(jnp.float32)

    kernel = functools.partial(_upsample_kernel,
                               cin=cin, c_f=c_f, th=th, wp=wp, wd=wd)

    cost = pl.CostEstimate(
        flops=2 * b * cout * 9 * cin * h * wd + 16 * b * c_f * h * wd * wd,
        transcendentals=0,
        bytes_accessed=(x_tiles.size + w_p.size + p0.size + p1.size
                        + b * c_f * 4 * h * wd) * itemsize,
    )

    return pl.pallas_call(
        kernel,
        out_shape=jax.ShapeDtypeStruct((b, c_f, 2 * h, 2 * wd), x.dtype),
        grid=(b, nt),
        in_specs=[
            pl.BlockSpec((1, 1, cin, (th + 3) * wp), lambda bi, ri: (bi, ri, 0, 0)),
            pl.BlockSpec((cout, 9 * cin), lambda bi, ri: (0, 0)),
            pl.BlockSpec((wd, 2 * wd), lambda bi, ri: (0, 0)),
            pl.BlockSpec((wd, 2 * wd), lambda bi, ri: (0, 0)),
        ],
        out_specs=pl.BlockSpec((1, c_f, 2 * th, 2 * wd), lambda bi, ri: (bi, 0, ri, 0)),
        scratch_shapes=[
            pltpu.VMEM((9 * cin, th * wp), x.dtype),       # im2col RHS
            pltpu.VMEM((cout, th * wp), jnp.float32),      # conv accumulator
        ],
        compiler_params=pltpu.CompilerParams(
            dimension_semantics=("parallel", "parallel"),
        ),
        cost_estimate=cost,
    )(x_tiles, w_p, p0, p1)


def _reference_upsample(x, weight):
    conv = lax.conv_general_dilated(
        x, weight, window_strides=(1, 1), padding=((1, 1), (1, 1)),
        dimension_numbers=("NCHW", "OIHW", "NCHW"))
    b, cout, h, w = conv.shape
    c_f = cout // 4
    out = conv.reshape(b, c_f, 2, 2, h, w)
    return jnp.transpose(out, (0, 1, 4, 2, 5, 3)).reshape(b, c_f, 2 * h, 2 * w)


if __name__ == "__main__":
    key = jax.random.PRNGKey(0)
    kx, kw = jax.random.split(key, 2)

    B, n_feat, H, W = 2, 4, 16, 16
    # Small-integer-valued inputs/weights (exactly representable) so the MXU
    # result matches the XLA reference essentially bit-for-bit.
    x = jax.random.randint(kx, (B, n_feat, H, W), -3, 4).astype(jnp.float32)
    weight = (jax.random.randint(kw, (2 * n_feat, n_feat, 3, 3), -3, 4)
              .astype(jnp.float32) * 0.125)

    out = upsample_forward(x, weight)
    out = jax.block_until_ready(out)
    ref = _reference_upsample(x, weight)

    assert out.shape == (B, n_feat // 2, 2 * H, 2 * W), out.shape
    err = float(jnp.max(jnp.abs(out - ref)))
    if err <= 1e-4:
        print("KERNEL_OK")
    else:
        print(f"max abs err {err}")
</pallas_src>

<mosaic_0001>
module attributes {stable_mosaic.version = 11 : i64} {
  func.func @_upsample_kernel(%arg0: i32, %arg1: i32, %arg2: memref<1x1x4x342xf32, #tpu.memory_space<vmem>>, %arg3: memref<8x36xf32, #tpu.memory_space<vmem>>, %arg4: memref<16x32xf32, #tpu.memory_space<vmem>>, %arg5: memref<16x32xf32, #tpu.memory_space<vmem>>, %arg6: memref<1x2x32x32xf32, #tpu.memory_space<vmem>>, %arg7: memref<36x288xf32, #tpu.memory_space<vmem>>, %arg8: memref<8x288xf32, #tpu.memory_space<vmem>>) attributes {dimension_semantics = [#tpu.dimension_semantics<parallel>, #tpu.dimension_semantics<parallel>], iteration_bounds = array<i64: 2, 1>, scalar_prefetch = 0 : i64, scratch_operands = 2 : i64, tpu.core_type = #tpu.core_type<tc>, window_params = [{transform_indices = @transform_0, window_bounds = array<i64: 1, 1, 4, 342>}, {pipeline_mode = #tpu.pipeline_mode<synchronous>, transform_indices = @transform_1, window_bounds = array<i64: 8, 36>}, {pipeline_mode = #tpu.pipeline_mode<synchronous>, transform_indices = @transform_2, window_bounds = array<i64: 16, 32>}, {pipeline_mode = #tpu.pipeline_mode<synchronous>, transform_indices = @transform_3, window_bounds = array<i64: 16, 32>}, {transform_indices = @transform_4, window_bounds = array<i64: 1, 2, 32, 32>}]} {
    %c0 = arith.constant 0 : index
    %c0_0 = arith.constant 0 : index
    %c0_1 = arith.constant 0 : index
    %c0_2 = arith.constant 0 : index
    %0 = vector.load %arg2[%c0, %c0_0, %c0_1, %c0_2] : memref<1x1x4x342xf32, #tpu.memory_space<vmem>>, vector<1x1x4x288xf32>
    %1 = vector.shape_cast %0 : vector<1x1x4x288xf32> to vector<4x288xf32>
    %c0_3 = arith.constant 0 : index
    %c0_4 = arith.constant 0 : index
    %2 = vector.load %arg7[%c0_3, %c0_4] : memref<36x288xf32, #tpu.memory_space<vmem>>, vector<4x288xf32>
    tpu.vector_store %arg7[%c0_3, %c0_4], %1 {strides = array<i32>} : memref<36x288xf32, #tpu.memory_space<vmem>>, vector<4x288xf32>,
    %c0_5 = arith.constant 0 : index
    %c0_6 = arith.constant 0 : index
    %c0_7 = arith.constant 0 : index
    %c1 = arith.constant 1 : index
    %3 = vector.load %arg2[%c0_5, %c0_6, %c0_7, %c1] : memref<1x1x4x342xf32, #tpu.memory_space<vmem>>, vector<1x1x4x288xf32>
    %4 = vector.shape_cast %3 : vector<1x1x4x288xf32> to vector<4x288xf32>
    %c4 = arith.constant 4 : index
    %c0_8 = arith.constant 0 : index
    %5 = vector.load %arg7[%c4, %c0_8] : memref<36x288xf32, #tpu.memory_space<vmem>>, vector<4x288xf32>
    tpu.vector_store %arg7[%c4, %c0_8], %4 {strides = array<i32>} : memref<36x288xf32, #tpu.memory_space<vmem>>, vector<4x288xf32>,
    %c0_9 = arith.constant 0 : index
    %c0_10 = arith.constant 0 : index
    %c0_11 = arith.constant 0 : index
    %c2 = arith.constant 2 : index
    %6 = vector.load %arg2[%c0_9, %c0_10, %c0_11, %c2] : memref<1x1x4x342xf32, #tpu.memory_space<vmem>>, vector<1x1x4x288xf32>
    %7 = vector.shape_cast %6 : vector<1x1x4x288xf32> to vector<4x288xf32>
    %c8 = arith.constant 8 : index
    %c0_12 = arith.constant 0 : index
    %8 = vector.load %arg7[%c8, %c0_12] : memref<36x288xf32, #tpu.memory_space<vmem>>, vector<4x288xf32>
    tpu.vector_store %arg7[%c8, %c0_12], %7 {strides = array<i32>} : memref<36x288xf32, #tpu.memory_space<vmem>>, vector<4x288xf32>,
    %c0_13 = arith.constant 0 : index
    %c0_14 = arith.constant 0 : index
    %c0_15 = arith.constant 0 : index
    %c18 = arith.constant 18 : index
    %9 = vector.load %arg2[%c0_13, %c0_14, %c0_15, %c18] : memref<1x1x4x342xf32, #tpu.memory_space<vmem>>, vector<1x1x4x288xf32>
    %10 = vector.shape_cast %9 : vector<1x1x4x288xf32> to vector<4x288xf32>
    %c12 = arith.constant 12 : index
    %c0_16 = arith.constant 0 : index
    %11 = vector.load %arg7[%c12, %c0_16] : memref<36x288xf32, #tpu.memory_space<vmem>>, vector<4x288xf32>
    tpu.vector_store %arg7[%c12, %c0_16], %10 {strides = array<i32>} : memref<36x288xf32, #tpu.memory_space<vmem>>, vector<4x288xf32>,
    %c0_17 = arith.constant 0 : index
    %c0_18 = arith.constant 0 : index
    %c0_19 = arith.constant 0 : index
    %c19 = arith.constant 19 : index
    %12 = vector.load %arg2[%c0_17, %c0_18, %c0_19, %c19] : memref<1x1x4x342xf32, #tpu.memory_space<vmem>>, vector<1x1x4x288xf32>
    %13 = vector.shape_cast %12 : vector<1x1x4x288xf32> to vector<4x288xf32>
    %c16 = arith.constant 16 : index
    %c0_20 = arith.constant 0 : index
    %14 = vector.load %arg7[%c16, %c0_20] : memref<36x288xf32, #tpu.memory_space<vmem>>, vector<4x288xf32>
    tpu.vector_store %arg7[%c16, %c0_20], %13 {strides = array<i32>} : memref<36x288xf32, #tpu.memory_space<vmem>>, vector<4x288xf32>,
    %c0_21 = arith.constant 0 : index
    %c0_22 = arith.constant 0 : index
    %c0_23 = arith.constant 0 : index
    %c20 = arith.constant 20 : index
    %15 = vector.load %arg2[%c0_21, %c0_22, %c0_23, %c20] : memref<1x1x4x342xf32, #tpu.memory_space<vmem>>, vector<1x1x4x288xf32>
    %16 = vector.shape_cast %15 : vector<1x1x4x288xf32> to vector<4x288xf32>
    %c20_24 = arith.constant 20 : index
    %c0_25 = arith.constant 0 : index
    %17 = vector.load %arg7[%c20_24, %c0_25] : memref<36x288xf32, #tpu.memory_space<vmem>>, vector<4x288xf32>
    tpu.vector_store %arg7[%c20_24, %c0_25], %16 {strides = array<i32>} : memref<36x288xf32, #tpu.memory_space<vmem>>, vector<4x288xf32>,
    %c0_26 = arith.constant 0 : index
    %c0_27 = arith.constant 0 : index
    %c0_28 = arith.constant 0 : index
    %c36 = arith.constant 36 : index
    %18 = vector.load %arg2[%c0_26, %c0_27, %c0_28, %c36] : memref<1x1x4x342xf32, #tpu.memory_space<vmem>>, vector<1x1x4x288xf32>
    %19 = vector.shape_cast %18 : vector<1x1x4x288xf32> to vector<4x288xf32>
    %c24 = arith.constant 24 : index
    %c0_29 = arith.constant 0 : index
    %20 = vector.load %arg7[%c24, %c0_29] : memref<36x288xf32, #tpu.memory_space<vmem>>, vector<4x288xf32>
    tpu.vector_store %arg7[%c24, %c0_29], %19 {strides = array<i32>} : memref<36x288xf32, #tpu.memory_space<vmem>>, vector<4x288xf32>,
    %c0_30 = arith.constant 0 : index
    %c0_31 = arith.constant 0 : index
    %c0_32 = arith.constant 0 : index
    %c37 = arith.constant 37 : index
    %21 = vector.load %arg2[%c0_30, %c0_31, %c0_32, %c37] : memref<1x1x4x342xf32, #tpu.memory_space<vmem>>, vector<1x1x4x288xf32>
    %22 = vector.shape_cast %21 : vector<1x1x4x288xf32> to vector<4x288xf32>
    %c28 = arith.constant 28 : index
    %c0_33 = arith.constant 0 : index
    %23 = vector.load %arg7[%c28, %c0_33] : memref<36x288xf32, #tpu.memory_space<vmem>>, vector<4x288xf32>
    tpu.vector_store %arg7[%c28, %c0_33], %22 {strides = array<i32>} : memref<36x288xf32, #tpu.memory_space<vmem>>, vector<4x288xf32>,
    %c0_34 = arith.constant 0 : index
    %c0_35 = arith.constant 0 : index
    %c0_36 = arith.constant 0 : index
    %c38 = arith.constant 38 : index
    %24 = vector.load %arg2[%c0_34, %c0_35, %c0_36, %c38] : memref<1x1x4x342xf32, #tpu.memory_space<vmem>>, vector<1x1x4x288xf32>
    %25 = vector.shape_cast %24 : vector<1x1x4x288xf32> to vector<4x288xf32>
    %c32 = arith.constant 32 : index
    %c0_37 = arith.constant 0 : index
    %26 = vector.load %arg7[%c32, %c0_37] : memref<36x288xf32, #tpu.memory_space<vmem>>, vector<4x288xf32>
    tpu.vector_store %arg7[%c32, %c0_37], %25 {strides = array<i32>} : memref<36x288xf32, #tpu.memory_space<vmem>>, vector<4x288xf32>,
    %c0_38 = arith.constant 0 : index
    %c0_39 = arith.constant 0 : index
    %27 = vector.load %arg3[%c0_38, %c0_39] : memref<8x36xf32, #tpu.memory_space<vmem>>, vector<8x36xf32>
    %c0_40 = arith.constant 0 : index
    %c0_41 = arith.constant 0 : index
    %28 = vector.load %arg7[%c0_40, %c0_41] : memref<36x288xf32, #tpu.memory_space<vmem>>, vector<36x288xf32>
    %cst = arith.constant dense<0.000000e+00> : vector<8x288xf32>
    %29 = tpu.matmul %27, %28, %cst {dimension_numbers = #tpu.dot_dimension_numbers<[1], [0], [0], [1], [0, 0, 1, 1], [], []>} : vector<8x36xf32>, vector<36x288xf32>, vector<8x288xf32> -> vector<8x288xf32>
    %c0_42 = arith.constant 0 : index
    %c0_43 = arith.constant 0 : index
    %30 = vector.load %arg8[%c0_42, %c0_43] : memref<8x288xf32, #tpu.memory_space<vmem>>, vector<8x288xf32>
    tpu.vector_store %arg8[%c0_42, %c0_43], %29 {strides = array<i32>} : memref<8x288xf32, #tpu.memory_space<vmem>>, vector<8x288xf32>,
    %c0_44 = arith.constant 0 : index
    %c0_45 = arith.constant 0 : index
    %31 = vector.load %arg4[%c0_44, %c0_45] : memref<16x32xf32, #tpu.memory_space<vmem>>, vector<16x32xf32>
    %c0_46 = arith.constant 0 : index
    %c0_47 = arith.constant 0 : index
    %32 = vector.load %arg5[%c0_46, %c0_47] : memref<16x32xf32, #tpu.memory_space<vmem>>, vector<16x32xf32>
    %c0_48 = arith.constant 0 : index
    %c0_49 = arith.constant 0 : index
    %33 = vector.load %arg8[%c0_48, %c0_49] : memref<8x288xf32, #tpu.memory_space<vmem>>, vector<4x16xf32>
    %c4_50 = arith.constant 4 : index
    %c0_51 = arith.constant 0 : index
    %34 = vector.load %arg8[%c4_50, %c0_51] : memref<8x288xf32, #tpu.memory_space<vmem>>, vector<4x16xf32>
    %cst_52 = arith.constant dense<0.000000e+00> : vector<4x32xf32>
    %35 = tpu.matmul %33, %31, %cst_52 {dimension_numbers = #tpu.dot_dimension_numbers<[1], [0], [0], [1], [0, 0, 1, 1], [], []>} : vector<4x16xf32>, vector<16x32xf32>, vector<4x32xf32> -> vector<4x32xf32>
    %cst_53 = arith.constant dense<0.000000e+00> : vector<4x32xf32>
    %36 = tpu.matmul %34, %32, %cst_53 {dimension_numbers = #tpu.dot_dimension_numbers<[1], [0], [0], [1], [0, 0, 1, 1], [], []>} : vector<4x16xf32>, vector<16x32xf32>, vector<4x32xf32> -> vector<4x32xf32>
    %37 = arith.addf %35, %36 : vector<4x32xf32>
    %38 = vector.extract_strided_slice %37 {offsets = [0, 0], sizes = [2, 32], strides = [1, 1]} : vector<4x32xf32> to vector<2x32xf32>
    %c0_54 = arith.constant 0 : index
    %c0_55 = arith.constant 0 : index
    %c0_56 = arith.constant 0 : index
    %c0_57 = arith.constant 0 : index
    %39 = vector.load %arg6[%c0_54, %c0_55, %c0_56, %c0_57] : memref<1x2x32x32xf32, #tpu.memory_space<vmem>>, vector<1x2x1x32xf32>
    %40 = vector.shape_cast %39 : vector<1x2x1x32xf32> to vector<2x32xf32>
    %41 = vector.shape_cast %38 : vector<2x32xf32> to vector<1x2x1x32xf32>
    tpu.vector_store %arg6[%c0_54, %c0_55, %c0_56, %c0_57], %41 {strides = array<i32>} : memref<1x2x32x32xf32, #tpu.memory_space<vmem>>, vector<1x2x1x32xf32>,
    %42 = vector.extract_strided_slice %37 {offsets = [2, 0], sizes = [2, 32], strides = [1, 1]} : vector<4x32xf32> to vector<2x32xf32>
    %c0_58 = arith.constant 0 : index
    %c0_59 = arith.constant 0 : index
    %c1_60 = arith.constant 1 : index
    %c0_61 = arith.constant 0 : index
    %43 = vector.load %arg6[%c0_58, %c0_59, %c1_60, %c0_61] : memref<1x2x32x32xf32, #tpu.memory_space<vmem>>, vector<1x2x1x32xf32>
    %44 = vector.shape_cast %43 : vector<1x2x1x32xf32> to vector<2x32xf32>
    %45 = vector.shape_cast %42 : vector<2x32xf32> to vector<1x2x1x32xf32>
    tpu.vector_store %arg6[%c0_58, %c0_59, %c1_60, %c0_61], %45 {strides = array<i32>} : memref<1x2x32x32xf32, #tpu.memory_space<vmem>>, vector<1x2x1x32xf32>,
    %c0_62 = arith.constant 0 : index
    %c18_63 = arith.constant 18 : index
    %46 = vector.load %arg8[%c0_62, %c18_63] : memref<8x288xf32, #tpu.memory_space<vmem>>, vector<4x16xf32>
    %c4_64 = arith.constant 4 : index
    %c18_65 = arith.constant 18 : index
    %47 = vector.load %arg8[%c4_64, %c18_65] : memref<8x288xf32, #tpu.memory_space<vmem>>, vector<4x16xf32>
    %cst_66 = arith.constant dense<0.000000e+00> : vector<4x32xf32>
    %48 = tpu.matmul %46, %31, %cst_66 {dimension_numbers = #tpu.dot_dimension_numbers<[1], [0], [0], [1], [0, 0, 1, 1], [], []>} : vector<4x16xf32>, vector<16x32xf32>, vector<4x32xf32> -> vector<4x32xf32>
    %cst_67 = arith.constant dense<0.000000e+00> : vector<4x32xf32>
    %49 = tpu.matmul %47, %32, %cst_67 {dimension_numbers = #tpu.dot_dimension_numbers<[1], [0], [0], [1], [0, 0, 1, 1], [], []>} : vector<4x16xf32>, vector<16x32xf32>, vector<4x32xf32> -> vector<4x32xf32>
    %50 = arith.addf %48, %49 : vector<4x32xf32>
    %51 = vector.extract_strided_slice %50 {offsets = [0, 0], sizes = [2, 32], strides = [1, 1]} : vector<4x32xf32> to vector<2x32xf32>
    %c0_68 = arith.constant 0 : index
    %c0_69 = arith.constant 0 : index
    %c2_70 = arith.constant 2 : index
    %c0_71 = arith.constant 0 : index
    %52 = vector.load %arg6[%c0_68, %c0_69, %c2_70, %c0_71] : memref<1x2x32x32xf32, #tpu.memory_space<vmem>>, vector<1x2x1x32xf32>
    %53 = vector.shape_cast %52 : vector<1x2x1x32xf32> to vector<2x32xf32>
    %54 = vector.shape_cast %51 : vector<2x32xf32> to vector<1x2x1x32xf32>
    tpu.vector_store %arg6[%c0_68, %c0_69, %c2_70, %c0_71], %54 {strides = array<i32>} : memref<1x2x32x32xf32, #tpu.memory_space<vmem>>, vector<1x2x1x32xf32>,
    %55 = vector.extract_strided_slice %50 {offsets = [2, 0], sizes = [2, 32], strides = [1, 1]} : vector<4x32xf32> to vector<2x32xf32>
    %c0_72 = arith.constant 0 : index
    %c0_73 = arith.constant 0 : index
    %c3 = arith.constant 3 : index
    %c0_74 = arith.constant 0 : index
    %56 = vector.load %arg6[%c0_72, %c0_73, %c3, %c0_74] : memref<1x2x32x32xf32, #tpu.memory_space<vmem>>, vector<1x2x1x32xf32>
    %57 = vector.shape_cast %56 : vector<1x2x1x32xf32> to vector<2x32xf32>
    %58 = vector.shape_cast %55 : vector<2x32xf32> to vector<1x2x1x32xf32>
    tpu.vector_store %arg6[%c0_72, %c0_73, %c3, %c0_74], %58 {strides = array<i32>} : memref<1x2x32x32xf32, #tpu.memory_space<vmem>>, vector<1x2x1x32xf32>,
    %c0_75 = arith.constant 0 : index
    %c36_76 = arith.constant 36 : index
    %59 = vector.load %arg8[%c0_75, %c36_76] : memref<8x288xf32, #tpu.memory_space<vmem>>, vector<4x16xf32>
    %c4_77 = arith.constant 4 : index
    %c36_78 = arith.constant 36 : index
    %60 = vector.load %arg8[%c4_77, %c36_78] : memref<8x288xf32, #tpu.memory_space<vmem>>, vector<4x16xf32>
    %cst_79 = arith.constant dense<0.000000e+00> : vector<4x32xf32>
    %61 = tpu.matmul %59, %31, %cst_79 {dimension_numbers = #tpu.dot_dimension_numbers<[1], [0], [0], [1], [0, 0, 1, 1], [], []>} : vector<4x16xf32>, vector<16x32xf32>, vector<4x32xf32> -> vector<4x32xf32>
    %cst_80 = arith.constant dense<0.000000e+00> : vector<4x32xf32>
    %62 = tpu.matmul %60, %32, %cst_80 {dimension_numbers = #tpu.dot_dimension_numbers<[1], [0], [0], [1], [0, 0, 1, 1], [], []>} : vector<4x16xf32>, vector<16x32xf32>, vector<4x32xf32> -> vector<4x32xf32>
    %63 = arith.addf %61, %62 : vector<4x32xf32>
    %64 = vector.extract_strided_slice %63 {offsets = [0, 0], sizes = [2, 32], strides = [1, 1]} : vector<4x32xf32> to vector<2x32xf32>
    %c0_81 = arith.constant 0 : index
    %c0_82 = arith.constant 0 : index
    %c4_83 = arith.constant 4 : index
    %c0_84 = arith.constant 0 : index
    %65 = vector.load %arg6[%c0_81, %c0_82, %c4_83, %c0_84] : memref<1x2x32x32xf32, #tpu.memory_space<vmem>>, vector<1x2x1x32xf32>
    %66 = vector.shape_cast %65 : vector<1x2x1x32xf32> to vector<2x32xf32>
    %67 = vector.shape_cast %64 : vector<2x32xf32> to vector<1x2x1x32xf32>
    tpu.vector_store %arg6[%c0_81, %c0_82, %c4_83, %c0_84], %67 {strides = array<i32>} : memref<1x2x32x32xf32, #tpu.memory_space<vmem>>, vector<1x2x1x32xf32>,
    %68 = vector.extract_strided_slice %63 {offsets = [2, 0], sizes = [2, 32], strides = [1, 1]} : vector<4x32xf32> to vector<2x32xf32>
    %c0_85 = arith.constant 0 : index
    %c0_86 = arith.constant 0 : index
    %c5 = arith.constant 5 : index
    %c0_87 = arith.constant 0 : index
    %69 = vector.load %arg6[%c0_85, %c0_86, %c5, %c0_87] : memref<1x2x32x32xf32, #tpu.memory_space<vmem>>, vector<1x2x1x32xf32>
    %70 = vector.shape_cast %69 : vector<1x2x1x32xf32> to vector<2x32xf32>
    %71 = vector.shape_cast %68 : vector<2x32xf32> to vector<1x2x1x32xf32>
    tpu.vector_store %arg6[%c0_85, %c0_86, %c5, %c0_87], %71 {strides = array<i32>} : memref<1x2x32x32xf32, #tpu.memory_space<vmem>>, vector<1x2x1x32xf32>,
    %c0_88 = arith.constant 0 : index
    %c54 = arith.constant 54 : index
    %72 = vector.load %arg8[%c0_88, %c54] : memref<8x288xf32, #tpu.memory_space<vmem>>, vector<4x16xf32>
    %c4_89 = arith.constant 4 : index
    %c54_90 = arith.constant 54 : index
    %73 = vector.load %arg8[%c4_89, %c54_90] : memref<8x288xf32, #tpu.memory_space<vmem>>, vector<4x16xf32>
    %cst_91 = arith.constant dense<0.000000e+00> : vector<4x32xf32>
    %74 = tpu.matmul %72, %31, %cst_91 {dimension_numbers = #tpu.dot_dimension_numbers<[1], [0], [0], [1], [0, 0, 1, 1], [], []>} : vector<4x16xf32>, vector<16x32xf32>, vector<4x32xf32> -> vector<4x32xf32>
    %cst_92 = arith.constant dense<0.000000e+00> : vector<4x32xf32>
    %75 = tpu.matmul %73, %32, %cst_92 {dimension_numbers = #tpu.dot_dimension_numbers<[1], [0], [0], [1], [0, 0, 1, 1], [], []>} : vector<4x16xf32>, vector<16x32xf32>, vector<4x32xf32> -> vector<4x32xf32>
    %76 = arith.addf %74, %75 : vector<4x32xf32>
    %77 = vector.extract_strided_slice %76 {offsets = [0, 0], sizes = [2, 32], strides = [1, 1]} : vector<4x32xf32> to vector<2x32xf32>
    %c0_93 = arith.constant 0 : index
    %c0_94 = arith.constant 0 : index
    %c6 = arith.constant 6 : index
    %c0_95 = arith.constant 0 : index
    %78 = vector.load %arg6[%c0_93, %c0_94, %c6, %c0_95] : memref<1x2x32x32xf32, #tpu.memory_space<vmem>>, vector<1x2x1x32xf32>
    %79 = vector.shape_cast %78 : vector<1x2x1x32xf32> to vector<2x32xf32>
    %80 = vector.shape_cast %77 : vector<2x32xf32> to vector<1x2x1x32xf32>
    tpu.vector_store %arg6[%c0_93, %c0_94, %c6, %c0_95], %80 {strides = array<i32>} : memref<1x2x32x32xf32, #tpu.memory_space<vmem>>, vector<1x2x1x32xf32>,
    %81 = vector.extract_strided_slice %76 {offsets = [2, 0], sizes = [2, 32], strides = [1, 1]} : vector<4x32xf32> to vector<2x32xf32>
    %c0_96 = arith.constant 0 : index
    %c0_97 = arith.constant 0 : index
    %c7 = arith.constant 7 : index
    %c0_98 = arith.constant 0 : index
    %82 = vector.load %arg6[%c0_96, %c0_97, %c7, %c0_98] : memref<1x2x32x32xf32, #tpu.memory_space<vmem>>, vector<1x2x1x32xf32>
    %83 = vector.shape_cast %82 : vector<1x2x1x32xf32> to vector<2x32xf32>
    %84 = vector.shape_cast %81 : vector<2x32xf32> to vector<1x2x1x32xf32>
    tpu.vector_store %arg6[%c0_96, %c0_97, %c7, %c0_98], %84 {strides = array<i32>} : memref<1x2x32x32xf32, #tpu.memory_space<vmem>>, vector<1x2x1x32xf32>,
    %c0_99 = arith.constant 0 : index
    %c72 = arith.constant 72 : index
    %85 = vector.load %arg8[%c0_99, %c72] : memref<8x288xf32, #tpu.memory_space<vmem>>, vector<4x16xf32>
    %c4_100 = arith.constant 4 : index
    %c72_101 = arith.constant 72 : index
    %86 = vector.load %arg8[%c4_100, %c72_101] : memref<8x288xf32, #tpu.memory_space<vmem>>, vector<4x16xf32>
    %cst_102 = arith.constant dense<0.000000e+00> : vector<4x32xf32>
    %87 = tpu.matmul %85, %31, %cst_102 {dimension_numbers = #tpu.dot_dimension_numbers<[1], [0], [0], [1], [0, 0, 1, 1], [], []>} : vector<4x16xf32>, vector<16x32xf32>, vector<4x32xf32> -> vector<4x32xf32>
    %cst_103 = arith.constant dense<0.000000e+00> : vector<4x32xf32>
    %88 = tpu.matmul %86, %32, %cst_103 {dimension_numbers = #tpu.dot_dimension_numbers<[1], [0], [0], [1], [0, 0, 1, 1], [], []>} : vector<4x16xf32>, vector<16x32xf32>, vector<4x32xf32> -> vector<4x32xf32>
    %89 = arith.addf %87, %88 : vector<4x32xf32>
    %90 = vector.extract_strided_slice %89 {offsets = [0, 0], sizes = [2, 32], strides = [1, 1]} : vector<4x32xf32> to vector<2x32xf32>
    %c0_104 = arith.constant 0 : index
    %c0_105 = arith.constant 0 : index
    %c8_106 = arith.constant 8 : index
    %c0_107 = arith.constant 0 : index
    %91 = vector.load %arg6[%c0_104, %c0_105, %c8_106, %c0_107] : memref<1x2x32x32xf32, #tpu.memory_space<vmem>>, vector<1x2x1x32xf32>
    %92 = vector.shape_cast %91 : vector<1x2x1x32xf32> to vector<2x32xf32>
    %93 = vector.shape_cast %90 : vector<2x32xf32> to vector<1x2x1x32xf32>
    tpu.vector_store %arg6[%c0_104, %c0_105, %c8_106, %c0_107], %93 {strides = array<i32>} : memref<1x2x32x32xf32, #tpu.memory_space<vmem>>, vector<1x2x1x32xf32>,
    %94 = vector.extract_strided_slice %89 {offsets = [2, 0], sizes = [2, 32], strides = [1, 1]} : vector<4x32xf32> to vector<2x32xf32>
    %c0_108 = arith.constant 0 : index
    %c0_109 = arith.constant 0 : index
    %c9 = arith.constant 9 : index
    %c0_110 = arith.constant 0 : index
    %95 = vector.load %arg6[%c0_108, %c0_109, %c9, %c0_110] : memref<1x2x32x32xf32, #tpu.memory_space<vmem>>, vector<1x2x1x32xf32>
    %96 = vector.shape_cast %95 : vector<1x2x1x32xf32> to vector<2x32xf32>
    %97 = vector.shape_cast %94 : vector<2x32xf32> to vector<1x2x1x32xf32>
    tpu.vector_store %arg6[%c0_108, %c0_109, %c9, %c0_110], %97 {strides = array<i32>} : memref<1x2x32x32xf32, #tpu.memory_space<vmem>>, vector<1x2x1x32xf32>,
    %c0_111 = arith.constant 0 : index
    %c90 = arith.constant 90 : index
    %98 = vector.load %arg8[%c0_111, %c90] : memref<8x288xf32, #tpu.memory_space<vmem>>, vector<4x16xf32>
    %c4_112 = arith.constant 4 : index
    %c90_113 = arith.constant 90 : index
    %99 = vector.load %arg8[%c4_112, %c90_113] : memref<8x288xf32, #tpu.memory_space<vmem>>, vector<4x16xf32>
    %cst_114 = arith.constant dense<0.000000e+00> : vector<4x32xf32>
    %100 = tpu.matmul %98, %31, %cst_114 {dimension_numbers = #tpu.dot_dimension_numbers<[1], [0], [0], [1], [0, 0, 1, 1], [], []>} : vector<4x16xf32>, vector<16x32xf32>, vector<4x32xf32> -> vector<4x32xf32>
    %cst_115 = arith.constant dense<0.000000e+00> : vector<4x32xf32>
    %101 = tpu.matmul %99, %32, %cst_115 {dimension_numbers = #tpu.dot_dimension_numbers<[1], [0], [0], [1], [0, 0, 1, 1], [], []>} : vector<4x16xf32>, vector<16x32xf32>, vector<4x32xf32> -> vector<4x32xf32>
    %102 = arith.addf %100, %101 : vector<4x32xf32>
    %103 = vector.extract_strided_slice %102 {offsets = [0, 0], sizes = [2, 32], strides = [1, 1]} : vector<4x32xf32> to vector<2x32xf32>
    %c0_116 = arith.constant 0 : index
    %c0_117 = arith.constant 0 : index
    %c10 = arith.constant 10 : index
    %c0_118 = arith.constant 0 : index
    %104 = vector.load %arg6[%c0_116, %c0_117, %c10, %c0_118] : memref<1x2x32x32xf32, #tpu.memory_space<vmem>>, vector<1x2x1x32xf32>
    %105 = vector.shape_cast %104 : vector<1x2x1x32xf32> to vector<2x32xf32>
    %106 = vector.shape_cast %103 : vector<2x32xf32> to vector<1x2x1x32xf32>
    tpu.vector_store %arg6[%c0_116, %c0_117, %c10, %c0_118], %106 {strides = array<i32>} : memref<1x2x32x32xf32, #tpu.memory_space<vmem>>, vector<1x2x1x32xf32>,
    %107 = vector.extract_strided_slice %102 {offsets = [2, 0], sizes = [2, 32], strides = [1, 1]} : vector<4x32xf32> to vector<2x32xf32>
    %c0_119 = arith.constant 0 : index
    %c0_120 = arith.constant 0 : index
    %c11 = arith.constant 11 : index
    %c0_121 = arith.constant 0 : index
    %108 = vector.load %arg6[%c0_119, %c0_120, %c11, %c0_121] : memref<1x2x32x32xf32, #tpu.memory_space<vmem>>, vector<1x2x1x32xf32>
    %109 = vector.shape_cast %108 : vector<1x2x1x32xf32> to vector<2x32xf32>
    %110 = vector.shape_cast %107 : vector<2x32xf32> to vector<1x2x1x32xf32>
    tpu.vector_store %arg6[%c0_119, %c0_120, %c11, %c0_121], %110 {strides = array<i32>} : memref<1x2x32x32xf32, #tpu.memory_space<vmem>>, vector<1x2x1x32xf32>,
    %c0_122 = arith.constant 0 : index
    %c108 = arith.constant 108 : index
    %111 = vector.load %arg8[%c0_122, %c108] : memref<8x288xf32, #tpu.memory_space<vmem>>, vector<4x16xf32>
    %c4_123 = arith.constant 4 : index
    %c108_124 = arith.constant 108 : index
    %112 = vector.load %arg8[%c4_123, %c108_124] : memref<8x288xf32, #tpu.memory_space<vmem>>, vector<4x16xf32>
    %cst_125 = arith.constant dense<0.000000e+00> : vector<4x32xf32>
    %113 = tpu.matmul %111, %31, %cst_125 {dimension_numbers = #tpu.dot_dimension_numbers<[1], [0], [0], [1], [0, 0, 1, 1], [], []>} : vector<4x16xf32>, vector<16x32xf32>, vector<4x32xf32> -> vector<4x32xf32>
    %cst_126 = arith.constant dense<0.000000e+00> : vector<4x32xf32>
    %114 = tpu.matmul %112, %32, %cst_126 {dimension_numbers = #tpu.dot_dimension_numbers<[1], [0], [0], [1], [0, 0, 1, 1], [], []>} : vector<4x16xf32>, vector<16x32xf32>, vector<4x32xf32> -> vector<4x32xf32>
    %115 = arith.addf %113, %114 : vector<4x32xf32>
    %116 = vector.extract_strided_slice %115 {offsets = [0, 0], sizes = [2, 32], strides = [1, 1]} : vector<4x32xf32> to vector<2x32xf32>
    %c0_127 = arith.constant 0 : index
    %c0_128 = arith.constant 0 : index
    %c12_129 = arith.constant 12 : index
    %c0_130 = arith.constant 0 : index
    %117 = vector.load %arg6[%c0_127, %c0_128, %c12_129, %c0_130] : memref<1x2x32x32xf32, #tpu.memory_space<vmem>>, vector<1x2x1x32xf32>
    %118 = vector.shape_cast %117 : vector<1x2x1x32xf32> to vector<2x32xf32>
    %119 = vector.shape_cast %116 : vector<2x32xf32> to vector<1x2x1x32xf32>
    tpu.vector_store %arg6[%c0_127, %c0_128, %c12_129, %c0_130], %119 {strides = array<i32>} : memref<1x2x32x32xf32, #tpu.memory_space<vmem>>, vector<1x2x1x32xf32>,
    %120 = vector.extract_strided_slice %115 {offsets = [2, 0], sizes = [2, 32], strides = [1, 1]} : vector<4x32xf32> to vector<2x32xf32>
    %c0_131 = arith.constant 0 : index
    %c0_132 = arith.constant 0 : index
    %c13 = arith.constant 13 : index
    %c0_133 = arith.constant 0 : index
    %121 = vector.load %arg6[%c0_131, %c0_132, %c13, %c0_133] : memref<1x2x32x32xf32, #tpu.memory_space<vmem>>, vector<1x2x1x32xf32>
    %122 = vector.shape_cast %121 : vector<1x2x1x32xf32> to vector<2x32xf32>
    %123 = vector.shape_cast %120 : vector<2x32xf32> to vector<1x2x1x32xf32>
    tpu.vector_store %arg6[%c0_131, %c0_132, %c13, %c0_133], %123 {strides = array<i32>} : memref<1x2x32x32xf32, #tpu.memory_space<vmem>>, vector<1x2x1x32xf32>,
    %c0_134 = arith.constant 0 : index
    %c126 = arith.constant 126 : index
    %124 = vector.load %arg8[%c0_134, %c126] : memref<8x288xf32, #tpu.memory_space<vmem>>, vector<4x16xf32>
    %c4_135 = arith.constant 4 : index
    %c126_136 = arith.constant 126 : index
    %125 = vector.load %arg8[%c4_135, %c126_136] : memref<8x288xf32, #tpu.memory_space<vmem>>, vector<4x16xf32>
    %cst_137 = arith.constant dense<0.000000e+00> : vector<4x32xf32>
    %126 = tpu.matmul %124, %31, %cst_137 {dimension_numbers = #tpu.dot_dimension_numbers<[1], [0], [0], [1], [0, 0, 1, 1], [], []>} : vector<4x16xf32>, vector<16x32xf32>, vector<4x32xf32> -> vector<4x32xf32>
    %cst_138 = arith.constant dense<0.000000e+00> : vector<4x32xf32>
    %127 = tpu.matmul %125, %32, %cst_138 {dimension_numbers = #tpu.dot_dimension_numbers<[1], [0], [0], [1], [0, 0, 1, 1], [], []>} : vector<4x16xf32>, vector<16x32xf32>, vector<4x32xf32> -> vector<4x32xf32>
    %128 = arith.addf %126, %127 : vector<4x32xf32>
    %129 = vector.extract_strided_slice %128 {offsets = [0, 0], sizes = [2, 32], strides = [1, 1]} : vector<4x32xf32> to vector<2x32xf32>
    %c0_139 = arith.constant 0 : index
    %c0_140 = arith.constant 0 : index
    %c14 = arith.constant 14 : index
    %c0_141 = arith.constant 0 : index
    %130 = vector.load %arg6[%c0_139, %c0_140, %c14, %c0_141] : memref<1x2x32x32xf32, #tpu.memory_space<vmem>>, vector<1x2x1x32xf32>
    %131 = vector.shape_cast %130 : vector<1x2x1x32xf32> to vector<2x32xf32>
    %132 = vector.shape_cast %129 : vector<2x32xf32> to vector<1x2x1x32xf32>
    tpu.vector_store %arg6[%c0_139, %c0_140, %c14, %c0_141], %132 {strides = array<i32>} : memref<1x2x32x32xf32, #tpu.memory_space<vmem>>, vector<1x2x1x32xf32>,
    %133 = vector.extract_strided_slice %128 {offsets = [2, 0], sizes = [2, 32], strides = [1, 1]} : vector<4x32xf32> to vector<2x32xf32>
    %c0_142 = arith.constant 0 : index
    %c0_143 = arith.constant 0 : index
    %c15 = arith.constant 15 : index
    %c0_144 = arith.constant 0 : index
    %134 = vector.load %arg6[%c0_142, %c0_143, %c15, %c0_144] : memref<1x2x32x32xf32, #tpu.memory_space<vmem>>, vector<1x2x1x32xf32>
    %135 = vector.shape_cast %134 : vector<1x2x1x32xf32> to vector<2x32xf32>
    %136 = vector.shape_cast %133 : vector<2x32xf32> to vector<1x2x1x32xf32>
    tpu.vector_store %arg6[%c0_142, %c0_143, %c15, %c0_144], %136 {strides = array<i32>} : memref<1x2x32x32xf32, #tpu.memory_space<vmem>>, vector<1x2x1x32xf32>,
    %c0_145 = arith.constant 0 : index
    %c144 = arith.constant 144 : index
    %137 = vector.load %arg8[%c0_145, %c144] : memref<8x288xf32, #tpu.memory_space<vmem>>, vector<4x16xf32>
    %c4_146 = arith.constant 4 : index
    %c144_147 = arith.constant 144 : index
    %138 = vector.load %arg8[%c4_146, %c144_147] : memref<8x288xf32, #tpu.memory_space<vmem>>, vector<4x16xf32>
    %cst_148 = arith.constant dense<0.000000e+00> : vector<4x32xf32>
    %139 = tpu.matmul %137, %31, %cst_148 {dimension_numbers = #tpu.dot_dimension_numbers<[1], [0], [0], [1], [0, 0, 1, 1], [], []>} : vector<4x16xf32>, vector<16x32xf32>, vector<4x32xf32> -> vector<4x32xf32>
    %cst_149 = arith.constant dense<0.000000e+00> : vector<4x32xf32>
    %140 = tpu.matmul %138, %32, %cst_149 {dimension_numbers = #tpu.dot_dimension_numbers<[1], [0], [0], [1], [0, 0, 1, 1], [], []>} : vector<4x16xf32>, vector<16x32xf32>, vector<4x32xf32> -> vector<4x32xf32>
    %141 = arith.addf %139, %140 : vector<4x32xf32>
    %142 = vector.extract_strided_slice %141 {offsets = [0, 0], sizes = [2, 32], strides = [1, 1]} : vector<4x32xf32> to vector<2x32xf32>
    %c0_150 = arith.constant 0 : index
    %c0_151 = arith.constant 0 : index
    %c16_152 = arith.constant 16 : index
    %c0_153 = arith.constant 0 : index
    %143 = vector.load %arg6[%c0_150, %c0_151, %c16_152, %c0_153] : memref<1x2x32x32xf32, #tpu.memory_space<vmem>>, vector<1x2x1x32xf32>
    %144 = vector.shape_cast %143 : vector<1x2x1x32xf32> to vector<2x32xf32>
    %145 = vector.shape_cast %142 : vector<2x32xf32> to vector<1x2x1x32xf32>
    tpu.vector_store %arg6[%c0_150, %c0_151, %c16_152, %c0_153], %145 {strides = array<i32>} : memref<1x2x32x32xf32, #tpu.memory_space<vmem>>, vector<1x2x1x32xf32>,
    %146 = vector.extract_strided_slice %141 {offsets = [2, 0], sizes = [2, 32], strides = [1, 1]} : vector<4x32xf32> to vector<2x32xf32>
    %c0_154 = arith.constant 0 : index
    %c0_155 = arith.constant 0 : index
    %c17 = arith.constant 17 : index
    %c0_156 = arith.constant 0 : index
    %147 = vector.load %arg6[%c0_154, %c0_155, %c17, %c0_156] : memref<1x2x32x32xf32, #tpu.memory_space<vmem>>, vector<1x2x1x32xf32>
    %148 = vector.shape_cast %147 : vector<1x2x1x32xf32> to vector<2x32xf32>
    %149 = vector.shape_cast %146 : vector<2x32xf32> to vector<1x2x1x32xf32>
    tpu.vector_store %arg6[%c0_154, %c0_155, %c17, %c0_156], %149 {strides = array<i32>} : memref<1x2x32x32xf32, #tpu.memory_space<vmem>>, vector<1x2x1x32xf32>,
    %c0_157 = arith.constant 0 : index
    %c162 = arith.constant 162 : index
    %150 = vector.load %arg8[%c0_157, %c162] : memref<8x288xf32, #tpu.memory_space<vmem>>, vector<4x16xf32>
    %c4_158 = arith.constant 4 : index
    %c162_159 = arith.constant 162 : index
    %151 = vector.load %arg8[%c4_158, %c162_159] : memref<8x288xf32, #tpu.memory_space<vmem>>, vector<4x16xf32>
    %cst_160 = arith.constant dense<0.000000e+00> : vector<4x32xf32>
    %152 = tpu.matmul %150, %31, %cst_160 {dimension_numbers = #tpu.dot_dimension_numbers<[1], [0], [0], [1], [0, 0, 1, 1], [], []>} : vector<4x16xf32>, vector<16x32xf32>, vector<4x32xf32> -> vector<4x32xf32>
    %cst_161 = arith.constant dense<0.000000e+00> : vector<4x32xf32>
    %153 = tpu.matmul %151, %32, %cst_161 {dimension_numbers = #tpu.dot_dimension_numbers<[1], [0], [0], [1], [0, 0, 1, 1], [], []>} : vector<4x16xf32>, vector<16x32xf32>, vector<4x32xf32> -> vector<4x32xf32>
    %154 = arith.addf %152, %153 : vector<4x32xf32>
    %155 = vector.extract_strided_slice %154 {offsets = [0, 0], sizes = [2, 32], strides = [1, 1]} : vector<4x32xf32> to vector<2x32xf32>
    %c0_162 = arith.constant 0 : index
    %c0_163 = arith.constant 0 : index
    %c18_164 = arith.constant 18 : index
    %c0_165 = arith.constant 0 : index
    %156 = vector.load %arg6[%c0_162, %c0_163, %c18_164, %c0_165] : memref<1x2x32x32xf32, #tpu.memory_space<vmem>>, vector<1x2x1x32xf32>
    %157 = vector.shape_cast %156 : vector<1x2x1x32xf32> to vector<2x32xf32>
    %158 = vector.shape_cast %155 : vector<2x32xf32> to vector<1x2x1x32xf32>
    tpu.vector_store %arg6[%c0_162, %c0_163, %c18_164, %c0_165], %158 {strides = array<i32>} : memref<1x2x32x32xf32, #tpu.memory_space<vmem>>, vector<1x2x1x32xf32>,
    %159 = vector.extract_strided_slice %154 {offsets = [2, 0], sizes = [2, 32], strides = [1, 1]} : vector<4x32xf32> to vector<2x32xf32>
    %c0_166 = arith.constant 0 : index
    %c0_167 = arith.constant 0 : index
    %c19_168 = arith.constant 19 : index
    %c0_169 = arith.constant 0 : index
    %160 = vector.load %arg6[%c0_166, %c0_167, %c19_168, %c0_169] : memref<1x2x32x32xf32, #tpu.memory_space<vmem>>, vector<1x2x1x32xf32>
    %161 = vector.shape_cast %160 : vector<1x2x1x32xf32> to vector<2x32xf32>
    %162 = vector.shape_cast %159 : vector<2x32xf32> to vector<1x2x1x32xf32>
    tpu.vector_store %arg6[%c0_166, %c0_167, %c19_168, %c0_169], %162 {strides = array<i32>} : memref<1x2x32x32xf32, #tpu.memory_space<vmem>>, vector<1x2x1x32xf32>,
    %c0_170 = arith.constant 0 : index
    %c180 = arith.constant 180 : index
    %163 = vector.load %arg8[%c0_170, %c180] : memref<8x288xf32, #tpu.memory_space<vmem>>, vector<4x16xf32>
    %c4_171 = arith.constant 4 : index
    %c180_172 = arith.constant 180 : index
    %164 = vector.load %arg8[%c4_171, %c180_172] : memref<8x288xf32, #tpu.memory_space<vmem>>, vector<4x16xf32>
    %cst_173 = arith.constant dense<0.000000e+00> : vector<4x32xf32>
    %165 = tpu.matmul %163, %31, %cst_173 {dimension_numbers = #tpu.dot_dimension_numbers<[1], [0], [0], [1], [0, 0, 1, 1], [], []>} : vector<4x16xf32>, vector<16x32xf32>, vector<4x32xf32> -> vector<4x32xf32>
    %cst_174 = arith.constant dense<0.000000e+00> : vector<4x32xf32>
    %166 = tpu.matmul %164, %32, %cst_174 {dimension_numbers = #tpu.dot_dimension_numbers<[1], [0], [0], [1], [0, 0, 1, 1], [], []>} : vector<4x16xf32>, vector<16x32xf32>, vector<4x32xf32> -> vector<4x32xf32>
    %167 = arith.addf %165, %166 : vector<4x32xf32>
    %168 = vector.extract_strided_slice %167 {offsets = [0, 0], sizes = [2, 32], strides = [1, 1]} : vector<4x32xf32> to vector<2x32xf32>
    %c0_175 = arith.constant 0 : index
    %c0_176 = arith.constant 0 : index
    %c20_177 = arith.constant 20 : index
    %c0_178 = arith.constant 0 : index
    %169 = vector.load %arg6[%c0_175, %c0_176, %c20_177, %c0_178] : memref<1x2x32x32xf32, #tpu.memory_space<vmem>>, vector<1x2x1x32xf32>
    %170 = vector.shape_cast %169 : vector<1x2x1x32xf32> to vector<2x32xf32>
    %171 = vector.shape_cast %168 : vector<2x32xf32> to vector<1x2x1x32xf32>
    tpu.vector_store %arg6[%c0_175, %c0_176, %c20_177, %c0_178], %171 {strides = array<i32>} : memref<1x2x32x32xf32, #tpu.memory_space<vmem>>, vector<1x2x1x32xf32>,
    %172 = vector.extract_strided_slice %167 {offsets = [2, 0], sizes = [2, 32], strides = [1, 1]} : vector<4x32xf32> to vector<2x32xf32>
    %c0_179 = arith.constant 0 : index
    %c0_180 = arith.constant 0 : index
    %c21 = arith.constant 21 : index
    %c0_181 = arith.constant 0 : index
    %173 = vector.load %arg6[%c0_179, %c0_180, %c21, %c0_181] : memref<1x2x32x32xf32, #tpu.memory_space<vmem>>, vector<1x2x1x32xf32>
    %174 = vector.shape_cast %173 : vector<1x2x1x32xf32> to vector<2x32xf32>
    %175 = vector.shape_cast %172 : vector<2x32xf32> to vector<1x2x1x32xf32>
    tpu.vector_store %arg6[%c0_179, %c0_180, %c21, %c0_181], %175 {strides = array<i32>} : memref<1x2x32x32xf32, #tpu.memory_space<vmem>>, vector<1x2x1x32xf32>,
    %c0_182 = arith.constant 0 : index
    %c198 = arith.constant 198 : index
    %176 = vector.load %arg8[%c0_182, %c198] : memref<8x288xf32, #tpu.memory_space<vmem>>, vector<4x16xf32>
    %c4_183 = arith.constant 4 : index
    %c198_184 = arith.constant 198 : index
    %177 = vector.load %arg8[%c4_183, %c198_184] : memref<8x288xf32, #tpu.memory_space<vmem>>, vector<4x16xf32>
    %cst_185 = arith.constant dense<0.000000e+00> : vector<4x32xf32>
    %178 = tpu.matmul %176, %31, %cst_185 {dimension_numbers = #tpu.dot_dimension_numbers<[1], [0], [0], [1], [0, 0, 1, 1], [], []>} : vector<4x16xf32>, vector<16x32xf32>, vector<4x32xf32> -> vector<4x32xf32>
    %cst_186 = arith.constant dense<0.000000e+00> : vector<4x32xf32>
    %179 = tpu.matmul %177, %32, %cst_186 {dimension_numbers = #tpu.dot_dimension_numbers<[1], [0], [0], [1], [0, 0, 1, 1], [], []>} : vector<4x16xf32>, vector<16x32xf32>, vector<4x32xf32> -> vector<4x32xf32>
    %180 = arith.addf %178, %179 : vector<4x32xf32>
    %181 = vector.extract_strided_slice %180 {offsets = [0, 0], sizes = [2, 32], strides = [1, 1]} : vector<4x32xf32> to vector<2x32xf32>
    %c0_187 = arith.constant 0 : index
    %c0_188 = arith.constant 0 : index
    %c22 = arith.constant 22 : index
    %c0_189 = arith.constant 0 : index
    %182 = vector.load %arg6[%c0_187, %c0_188, %c22, %c0_189] : memref<1x2x32x32xf32, #tpu.memory_space<vmem>>, vector<1x2x1x32xf32>
    %183 = vector.shape_cast %182 : vector<1x2x1x32xf32> to vector<2x32xf32>
    %184 = vector.shape_cast %181 : vector<2x32xf32> to vector<1x2x1x32xf32>
    tpu.vector_store %arg6[%c0_187, %c0_188, %c22, %c0_189], %184 {strides = array<i32>} : memref<1x2x32x32xf32, #tpu.memory_space<vmem>>, vector<1x2x1x32xf32>,
    %185 = vector.extract_strided_slice %180 {offsets = [2, 0], sizes = [2, 32], strides = [1, 1]} : vector<4x32xf32> to vector<2x32xf32>
    %c0_190 = arith.constant 0 : index
    %c0_191 = arith.constant 0 : index
    %c23 = arith.constant 23 : index
    %c0_192 = arith.constant 0 : index
    %186 = vector.load %arg6[%c0_190, %c0_191, %c23, %c0_192] : memref<1x2x32x32xf32, #tpu.memory_space<vmem>>, vector<1x2x1x32xf32>
    %187 = vector.shape_cast %186 : vector<1x2x1x32xf32> to vector<2x32xf32>
    %188 = vector.shape_cast %185 : vector<2x32xf32> to vector<1x2x1x32xf32>
    tpu.vector_store %arg6[%c0_190, %c0_191, %c23, %c0_192], %188 {strides = array<i32>} : memref<1x2x32x32xf32, #tpu.memory_space<vmem>>, vector<1x2x1x32xf32>,
    %c0_193 = arith.constant 0 : index
    %c216 = arith.constant 216 : index
    %189 = vector.load %arg8[%c0_193, %c216] : memref<8x288xf32, #tpu.memory_space<vmem>>, vector<4x16xf32>
    %c4_194 = arith.constant 4 : index
    %c216_195 = arith.constant 216 : index
    %190 = vector.load %arg8[%c4_194, %c216_195] : memref<8x288xf32, #tpu.memory_space<vmem>>, vector<4x16xf32>
    %cst_196 = arith.constant dense<0.000000e+00> : vector<4x32xf32>
    %191 = tpu.matmul %189, %31, %cst_196 {dimension_numbers = #tpu.dot_dimension_numbers<[1], [0], [0], [1], [0, 0, 1, 1], [], []>} : vector<4x16xf32>, vector<16x32xf32>, vector<4x32xf32> -> vector<4x32xf32>
    %cst_197 = arith.constant dense<0.000000e+00> : vector<4x32xf32>
    %192 = tpu.matmul %190, %32, %cst_197 {dimension_numbers = #tpu.dot_dimension_numbers<[1], [0], [0], [1], [0, 0, 1, 1], [], []>} : vector<4x16xf32>, vector<16x32xf32>, vector<4x32xf32> -> vector<4x32xf32>
    %193 = arith.addf %191, %192 : vector<4x32xf32>
    %194 = vector.extract_strided_slice %193 {offsets = [0, 0], sizes = [2, 32], strides = [1, 1]} : vector<4x32xf32> to vector<2x32xf32>
    %c0_198 = arith.constant 0 : index
    %c0_199 = arith.constant 0 : index
    %c24_200 = arith.constant 24 : index
    %c0_201 = arith.constant 0 : index
    %195 = vector.load %arg6[%c0_198, %c0_199, %c24_200, %c0_201] : memref<1x2x32x32xf32, #tpu.memory_space<vmem>>, vector<1x2x1x32xf32>
    %196 = vector.shape_cast %195 : vector<1x2x1x32xf32> to vector<2x32xf32>
    %197 = vector.shape_cast %194 : vector<2x32xf32> to vector<1x2x1x32xf32>
    tpu.vector_store %arg6[%c0_198, %c0_199, %c24_200, %c0_201], %197 {strides = array<i32>} : memref<1x2x32x32xf32, #tpu.memory_space<vmem>>, vector<1x2x1x32xf32>,
    %198 = vector.extract_strided_slice %193 {offsets = [2, 0], sizes = [2, 32], strides = [1, 1]} : vector<4x32xf32> to vector<2x32xf32>
    %c0_202 = arith.constant 0 : index
    %c0_203 = arith.constant 0 : index
    %c25 = arith.constant 25 : index
    %c0_204 = arith.constant 0 : index
    %199 = vector.load %arg6[%c0_202, %c0_203, %c25, %c0_204] : memref<1x2x32x32xf32, #tpu.memory_space<vmem>>, vector<1x2x1x32xf32>
    %200 = vector.shape_cast %199 : vector<1x2x1x32xf32> to vector<2x32xf32>
    %201 = vector.shape_cast %198 : vector<2x32xf32> to vector<1x2x1x32xf32>
    tpu.vector_store %arg6[%c0_202, %c0_203, %c25, %c0_204], %201 {strides = array<i32>} : memref<1x2x32x32xf32, #tpu.memory_space<vmem>>, vector<1x2x1x32xf32>,
    %c0_205 = arith.constant 0 : index
    %c234 = arith.constant 234 : index
    %202 = vector.load %arg8[%c0_205, %c234] : memref<8x288xf32, #tpu.memory_space<vmem>>, vector<4x16xf32>
    %c4_206 = arith.constant 4 : index
    %c234_207 = arith.constant 234 : index
    %203 = vector.load %arg8[%c4_206, %c234_207] : memref<8x288xf32, #tpu.memory_space<vmem>>, vector<4x16xf32>
    %cst_208 = arith.constant dense<0.000000e+00> : vector<4x32xf32>
    %204 = tpu.matmul %202, %31, %cst_208 {dimension_numbers = #tpu.dot_dimension_numbers<[1], [0], [0], [1], [0, 0, 1, 1], [], []>} : vector<4x16xf32>, vector<16x32xf32>, vector<4x32xf32> -> vector<4x32xf32>
    %cst_209 = arith.constant dense<0.000000e+00> : vector<4x32xf32>
    %205 = tpu.matmul %203, %32, %cst_209 {dimension_numbers = #tpu.dot_dimension_numbers<[1], [0], [0], [1], [0, 0, 1, 1], [], []>} : vector<4x16xf32>, vector<16x32xf32>, vector<4x32xf32> -> vector<4x32xf32>
    %206 = arith.addf %204, %205 : vector<4x32xf32>
    %207 = vector.extract_strided_slice %206 {offsets = [0, 0], sizes = [2, 32], strides = [1, 1]} : vector<4x32xf32> to vector<2x32xf32>
    %c0_210 = arith.constant 0 : index
    %c0_211 = arith.constant 0 : index
    %c26 = arith.constant 26 : index
    %c0_212 = arith.constant 0 : index
    %208 = vector.load %arg6[%c0_210, %c0_211, %c26, %c0_212] : memref<1x2x32x32xf32, #tpu.memory_space<vmem>>, vector<1x2x1x32xf32>
    %209 = vector.shape_cast %208 : vector<1x2x1x32xf32> to vector<2x32xf32>
    %210 = vector.shape_cast %207 : vector<2x32xf32> to vector<1x2x1x32xf32>
    tpu.vector_store %arg6[%c0_210, %c0_211, %c26, %c0_212], %210 {strides = array<i32>} : memref<1x2x32x32xf32, #tpu.memory_space<vmem>>, vector<1x2x1x32xf32>,
    %211 = vector.extract_strided_slice %206 {offsets = [2, 0], sizes = [2, 32], strides = [1, 1]} : vector<4x32xf32> to vector<2x32xf32>
    %c0_213 = arith.constant 0 : index
    %c0_214 = arith.constant 0 : index
    %c27 = arith.constant 27 : index
    %c0_215 = arith.constant 0 : index
    %212 = vector.load %arg6[%c0_213, %c0_214, %c27, %c0_215] : memref<1x2x32x32xf32, #tpu.memory_space<vmem>>, vector<1x2x1x32xf32>
    %213 = vector.shape_cast %212 : vector<1x2x1x32xf32> to vector<2x32xf32>
    %214 = vector.shape_cast %211 : vector<2x32xf32> to vector<1x2x1x32xf32>
    tpu.vector_store %arg6[%c0_213, %c0_214, %c27, %c0_215], %214 {strides = array<i32>} : memref<1x2x32x32xf32, #tpu.memory_space<vmem>>, vector<1x2x1x32xf32>,
    %c0_216 = arith.constant 0 : index
    %c252 = arith.constant 252 : index
    %215 = vector.load %arg8[%c0_216, %c252] : memref<8x288xf32, #tpu.memory_space<vmem>>, vector<4x16xf32>
    %c4_217 = arith.constant 4 : index
    %c252_218 = arith.constant 252 : index
    %216 = vector.load %arg8[%c4_217, %c252_218] : memref<8x288xf32, #tpu.memory_space<vmem>>, vector<4x16xf32>
    %cst_219 = arith.constant dense<0.000000e+00> : vector<4x32xf32>
    %217 = tpu.matmul %215, %31, %cst_219 {dimension_numbers = #tpu.dot_dimension_numbers<[1], [0], [0], [1], [0, 0, 1, 1], [], []>} : vector<4x16xf32>, vector<16x32xf32>, vector<4x32xf32> -> vector<4x32xf32>
    %cst_220 = arith.constant dense<0.000000e+00> : vector<4x32xf32>
    %218 = tpu.matmul %216, %32, %cst_220 {dimension_numbers = #tpu.dot_dimension_numbers<[1], [0], [0], [1], [0, 0, 1, 1], [], []>} : vector<4x16xf32>, vector<16x32xf32>, vector<4x32xf32> -> vector<4x32xf32>
    %219 = arith.addf %217, %218 : vector<4x32xf32>
    %220 = vector.extract_strided_slice %219 {offsets = [0, 0], sizes = [2, 32], strides = [1, 1]} : vector<4x32xf32> to vector<2x32xf32>
    %c0_221 = arith.constant 0 : index
    %c0_222 = arith.constant 0 : index
    %c28_223 = arith.constant 28 : index
    %c0_224 = arith.constant 0 : index
    %221 = vector.load %arg6[%c0_221, %c0_222, %c28_223, %c0_224] : memref<1x2x32x32xf32, #tpu.memory_space<vmem>>, vector<1x2x1x32xf32>
    %222 = vector.shape_cast %221 : vector<1x2x1x32xf32> to vector<2x32xf32>
    %223 = vector.shape_cast %220 : vector<2x32xf32> to vector<1x2x1x32xf32>
    tpu.vector_store %arg6[%c0_221, %c0_222, %c28_223, %c0_224], %223 {strides = array<i32>} : memref<1x2x32x32xf32, #tpu.memory_space<vmem>>, vector<1x2x1x32xf32>,
    %224 = vector.extract_strided_slice %219 {offsets = [2, 0], sizes = [2, 32], strides = [1, 1]} : vector<4x32xf32> to vector<2x32xf32>
    %c0_225 = arith.constant 0 : index
    %c0_226 = arith.constant 0 : index
    %c29 = arith.constant 29 : index
    %c0_227 = arith.constant 0 : index
    %225 = vector.load %arg6[%c0_225, %c0_226, %c29, %c0_227] : memref<1x2x32x32xf32, #tpu.memory_space<vmem>>, vector<1x2x1x32xf32>
    %226 = vector.shape_cast %225 : vector<1x2x1x32xf32> to vector<2x32xf32>
    %227 = vector.shape_cast %224 : vector<2x32xf32> to vector<1x2x1x32xf32>
    tpu.vector_store %arg6[%c0_225, %c0_226, %c29, %c0_227], %227 {strides = array<i32>} : memref<1x2x32x32xf32, #tpu.memory_space<vmem>>, vector<1x2x1x32xf32>,
    %c0_228 = arith.constant 0 : index
    %c270 = arith.constant 270 : index
    %228 = vector.load %arg8[%c0_228, %c270] : memref<8x288xf32, #tpu.memory_space<vmem>>, vector<4x16xf32>
    %c4_229 = arith.constant 4 : index
    %c270_230 = arith.constant 270 : index
    %229 = vector.load %arg8[%c4_229, %c270_230] : memref<8x288xf32, #tpu.memory_space<vmem>>, vector<4x16xf32>
    %cst_231 = arith.constant dense<0.000000e+00> : vector<4x32xf32>
    %230 = tpu.matmul %228, %31, %cst_231 {dimension_numbers = #tpu.dot_dimension_numbers<[1], [0], [0], [1], [0, 0, 1, 1], [], []>} : vector<4x16xf32>, vector<16x32xf32>, vector<4x32xf32> -> vector<4x32xf32>
    %cst_232 = arith.constant dense<0.000000e+00> : vector<4x32xf32>
    %231 = tpu.matmul %229, %32, %cst_232 {dimension_numbers = #tpu.dot_dimension_numbers<[1], [0], [0], [1], [0, 0, 1, 1], [], []>} : vector<4x16xf32>, vector<16x32xf32>, vector<4x32xf32> -> vector<4x32xf32>
    %232 = arith.addf %230, %231 : vector<4x32xf32>
    %233 = vector.extract_strided_slice %232 {offsets = [0, 0], sizes = [2, 32], strides = [1, 1]} : vector<4x32xf32> to vector<2x32xf32>
    %c0_233 = arith.constant 0 : index
    %c0_234 = arith.constant 0 : index
    %c30 = arith.constant 30 : index
    %c0_235 = arith.constant 0 : index
    %234 = vector.load %arg6[%c0_233, %c0_234, %c30, %c0_235] : memref<1x2x32x32xf32, #tpu.memory_space<vmem>>, vector<1x2x1x32xf32>
    %235 = vector.shape_cast %234 : vector<1x2x1x32xf32> to vector<2x32xf32>
    %236 = vector.shape_cast %233 : vector<2x32xf32> to vector<1x2x1x32xf32>
    tpu.vector_store %arg6[%c0_233, %c0_234, %c30, %c0_235], %236 {strides = array<i32>} : memref<1x2x32x32xf32, #tpu.memory_space<vmem>>, vector<1x2x1x32xf32>,
    %237 = vector.extract_strided_slice %232 {offsets = [2, 0], sizes = [2, 32], strides = [1, 1]} : vector<4x32xf32> to vector<2x32xf32>
    %c0_236 = arith.constant 0 : index
    %c0_237 = arith.constant 0 : index
    %c31 = arith.constant 31 : index
    %c0_238 = arith.constant 0 : index
    %238 = vector.load %arg6[%c0_236, %c0_237, %c31, %c0_238] : memref<1x2x32x32xf32, #tpu.memory_space<vmem>>, vector<1x2x1x32xf32>
    %239 = vector.shape_cast %238 : vector<1x2x1x32xf32> to vector<2x32xf32>
    %240 = vector.shape_cast %237 : vector<2x32xf32> to vector<1x2x1x32xf32>
    tpu.vector_store %arg6[%c0_236, %c0_237, %c31, %c0_238], %240 {strides = array<i32>} : memref<1x2x32x32xf32, #tpu.memory_space<vmem>>, vector<1x2x1x32xf32>,
    return
  }
  func.func @transform_0(%arg0: i32, %arg1: i32) -> (i32, i32, i32, i32) {
    %c0_i32 = arith.constant 0 : i32
    %c0_i32_0 = arith.constant 0 : i32
    %c0_i32_1 = arith.constant 0 : i32
    return %arg0, %arg1, %c0_i32, %c0_i32_0 : i32, i32, i32, i32
  }
  func.func @transform_1(%arg0: i32, %arg1: i32) -> (i32, i32) {
    %c0_i32 = arith.constant 0 : i32
    %c0_i32_0 = arith.constant 0 : i32
    %c0_i32_1 = arith.constant 0 : i32
    return %c0_i32, %c0_i32_0 : i32, i32
  }
  func.func @transform_2(%arg0: i32, %arg1: i32) -> (i32, i32) {
    %c0_i32 = arith.constant 0 : i32
    %c0_i32_0 = arith.constant 0 : i32
    %c0_i32_1 = arith.constant 0 : i32
    return %c0_i32, %c0_i32_0 : i32, i32
  }
  func.func @transform_3(%arg0: i32, %arg1: i32) -> (i32, i32) {
    %c0_i32 = arith.constant 0 : i32
    %c0_i32_0 = arith.constant 0 : i32
    %c0_i32_1 = arith.constant 0 : i32
    return %c0_i32, %c0_i32_0 : i32, i32
  }
  func.func @transform_4(%arg0: i32, %arg1: i32) -> (i32, i32, i32, i32) {
    %c0_i32 = arith.constant 0 : i32
    %c0_i32_0 = arith.constant 0 : i32
    %c0_i32_1 = arith.constant 0 : i32
    return %arg0, %c0_i32, %arg1, %c0_i32_0 : i32, i32, i32, i32
  }
}

</mosaic_0001>

<bundles_post_ra>
// kernel: tpu_custom_call.1
= control target key start
LH: loop header
LB: loop body
LE: loop exit
PB: predicated region body
PF: predicated region fallthrough
CT: control target
= control target key end

     0   :  { %s5206_s0 = inlined_call_operand.hbm [shape: f32[2,1,4,342], index: 0, kind: input, shape index: {}]   ;;  %s5207_s1 = inlined_call_operand.hbm [shape: f32[8,36], index: 1, kind: input, shape index: {}]   ;;  %s5208_s2 = inlined_call_operand.hbm [shape: f32[16,32], index: 2, kind: input, shape index: {}]   ;;  %s5209_s3 = inlined_call_operand.hbm [shape: f32[16,32], index: 3, kind: input, shape index: {}]   ;;  %s5210_s4 = inlined_call_operand.hbm [shape: f32[2,2,32,32], index: 4, kind: output, shape index: {}]  }
   0x1   :  { %5215 = sst [smem:[#allocation17_spill]] %s5207_s1 }
   0x2   :  { %5216 = sst [smem:[#allocation18_spill]] %s5208_s2 }
   0x3   :  { %9 = vsyncpa [#allocation5], 0 }
   0x4   :  { %11 = vsyncpa [#allocation5 + $0x1], 0 }
   0x5   :  { %12 = vsyncpa [#allocation8], 0 }
   0x6   :  { %13 = vsyncpa [#allocation11], 0 }
   0x7   :  { %14 = vsyncpa [#allocation6], 0 }
   0x8   :  { %16 = vsyncpa [#allocation6 + $0x1], 0  ;;  %s4537_s15 = smov 0   ;;  %s4539_s16 = smov 0  }
   0x9   :  { %s4541_s17 = smov 0   ;;  %s4543_s18 = smov 0  }
   0xa   :  { %s4545_s19 = smov 0   ;;  %s4547_s20 = smov 0  }
   0xb LB: > { %s3758_s21 = sadd.s32 4294967295, %s4477_s20   ;;  %s3759_s22 = sadd.s32 4294967294, %s4477_s20   ;;  %s4477_s20 = sphi %s4547_s20, %s22_s20   ;;  %s4473_s19 = sphi %s4545_s19, %s5237_s19   ;;  %s4469_s18 = sphi %s4543_s18, %s5236_s18   ;;  %s4465_s17 = sphi %s4541_s17, %s5235_s17   ;;  %s4461_s16 = sphi %s4539_s16, %s5234_s16   ;;  %s4457_s15 = sphi %s4537_s15, %s5233_s15  }
   0xc   : > { %p56_p0 = scmp.ne.s32.totalorder %s4461_s16, %s4457_s15  ;;  %p4571_p1 = scmp.eq.s32.totalorder %s3758_s21, 0 }
   0xd   : > { %p4575_p2 = scmp.eq.s32.totalorder %s3758_s21, 1  ;;  %p151_p3 = scmp.eq.s32.totalorder %s3759_s22, 1 }
   0xe   : > { %s5217_s23 = scalar_select %p4571_p1, 1, 0 }
   0xf   : > { %s5218_s24 = scalar_select %p4575_p2, 1, 0 }
  0x10   : > { %p4581_p4 = por %p4571_p1, %p56_p0  ;;  %p3760_p5 = scmp.ge.s32.totalorder %s4477_s20, 1 }
  0x11   : > { %p4586_p6 = por %p151_p3, %p56_p0  ;;  %p158_p7 = scmp.lt.s32.totalorder %s4477_s20, 3 }
  0x12   : > { %s5219_s25 = scalar_select %p4581_p4, 1, 0 }
  0x13   : > { %s5220_s26 = scalar_select %p4586_p6, 1, 0 }
  0x14   : > { %p4591_p8 = pnand %p3760_p5, %p158_p7  ;;  %s4479_s28 = smov [#allocation7]  }
  0x15   : > { %s171_s29 = sshll.u32 %s4479_s28, 4  ;;  %s4480_s30 = smov [#allocation9]   ;;  %s172_s29 = int_to_ptr.vmem [resolvable:$true] %s171_s29 }
  0x16   : > { %s5221_s27 = scalar_select %p4591_p8, 1, 0 }
  0x17   : > { %p4172_p10 = pneg %p4591_p8  ;;  %s181_s5 = sshll.u32 %s4480_s30, 4  ;;  %s182_s5 = int_to_ptr.vmem [resolvable:$true] %s181_s5 }
  0x18   : > { %s4481_s7 = smov [#allocation10]   ;;  %s4294_s9 = scalar_lea.vmem %s172_s29, 128 }
  0x19   : > { %p4600_p11 = pnand %p4172_p10, %p4571_p1  ;;  %s194_s8 = sshll.u32 %s4481_s7, 4  ;;  %s195_s8 = int_to_ptr.vmem [resolvable:$true] %s194_s8 }
  0x1a   : > { %p4295_p13 = scmp.ne.s32.totalorder %s172_s29, %s4294_s9  ;;  %p4302_p5 = scmp.lt.s32.totalorder %s172_s29, %s172_s29 }
  0x1b   : > { %p4285_p12 = pneg %p4600_p11  ;;  %p4303_p7 = scmp.lt.s32.totalorder %s4294_s9, %s4294_s9 }
  0x1d   : > { %p4297_p0 = pnand %p4295_p13, %p4285_p12  ;;  %p4304_p9 = por %p4303_p7, %p4302_p5 }
  0x1f   : > { %p4298_p3 = pneg %p4297_p0 }
  0x21   : > { %p4305_p10 = pnand %p4304_p9, %p4298_p3 }
  0x23   : > { %4308 = shalt.err (!%p4305_p10)
}
  0x24   : > { %s5223_s1 = sld [smem:[#allocation17_spill]]  ;;  %s4320_s12 = scalar_lea.vmem %s182_s5, 256 }
  0x25   : > { %p4321_p6 = scmp.ne.s32.totalorder %s182_s5, %s4320_s12  ;;  %p4328_p13 = scmp.lt.s32.totalorder %s182_s5, %s182_s5 }
  0x26   : > { %p4329_p0 = scmp.lt.s32.totalorder %s4320_s12, %s4320_s12 }
  0x27   : > { %p4323_p1 = pnand %p4321_p6, %p4285_p12 }
  0x28   : > { %p4330_p8 = por %p4329_p0, %p4328_p13 }
  0x29   : > { %p4324_p4 = pneg %p4323_p1 }
  0x2a   : > { %4175 = dma.hbm_to_vmem [thread:$0]  (!%p4600_p11), %s5223_s1, 128, %s172_s29, [#allocation8]  }
  0x2b   : > { %p4331_p2 = pnand %p4330_p8, %p4324_p4 }
  0x2d   : > { %4334 = shalt.err (!%p4331_p2)
}
  0x2e   : > { %s4482_s13 = smov 128   ;;  %s4483_s14 = smov 8  }
  0x2f   : > { %s5224_s2 = sld [smem:[#allocation18_spill]]  ;;  %s4346_s28 = scalar_lea.vmem %s195_s8, 256 }
  0x30   : > { %p4347_p9 = scmp.ne.s32.totalorder %s195_s8, %s4346_s28  ;;  %p4354_p3 = scmp.lt.s32.totalorder %s195_s8, %s195_s8 }
  0x31   : > { %p4355_p5 = scmp.lt.s32.totalorder %s4346_s28, %s4346_s28 }
  0x32   : > { %p4349_p1 = pnand %p4347_p9, %p4285_p12 }
  0x33   : > { %p4356_p4 = por %p4355_p5, %p4354_p3 }
  0x34   : > { %p4350_p6 = pneg %p4349_p1 }
  0x35   : > { %4178 = dma.hbm_to_vmem [thread:$0]  (!%p4600_p11), %s5224_s2, 256, %s182_s5, [#allocation8], %s4482_s13, %s4482_s13, %s4483_s14  }
  0x36   : > { %p4357_p2 = pnand %p4356_p4, %p4350_p6 }
  0x38   : > { %4360 = shalt.err (!%p4357_p2)
}
  0x39   : > { %4181 = dma.hbm_to_vmem [thread:$0]  (!%p4600_p11), %s5209_s3, 256, %s195_s8, [#allocation11], %s4482_s13, %s4482_s13, %s4483_s14  }
  0x3a   : > { %s43_s5 = sadd.s32 1, %s4465_s17  ;;  %s34_s7 = sadd.s32 1, %s4473_s19 }
  0x3b   : > { %p50_p8 = scmp.ne.s32.totalorder %s4465_s17, %s4461_s16  ;;  %p36_p12 = scmp.ge.s32.totalorder %s34_s7, 2 }
  0x3c   : > { %p51_p7 = scmp.eq.s32.totalorder %s4477_s20, 0  ;;  %p5225_p10 = scmp.ne.s32.totalorder %s5218_s24, 0 }
  0x3d   : > { %p4193_p0 = scmp.lt.s32.totalorder %s4477_s20, 2  ;;  %s5239_s7 = smov (%p36_p12, %s34_s7), 0 }
  0x3e   : > { %p4637_p13 = por %p5225_p10, %p50_p8  ;;  %p52_p9 = por %p51_p7, %p50_p8 }
  0x3f   : > { %s208_s9 = sand.u32 1, %s4465_s17   ;;  %s38_s10 = ssub.s32 %s4473_s19, %s5239_s7 }
  0x40   : > { %p41_p1 = scmp.eq.s32.totalorder %s38_s10, 0  ;;  %s4153_s8 = smul.u32 12, %s208_s9 }
  0x41   : > { %s4154_s11 = smul.u32 192, %s4473_s19  ;;  %p4648_p11 = pnand %p4193_p0, %p52_p9 }
  0x42   : > { %s4653_s24 = scalar_select %p41_p1, %s4465_s17, %s43_s5  }
  0x43   : > { %s220_s21 = scalar_lea.hbm %s5206_s0, %s4154_s11  ;;  %s212_s22 = scalar_lea.vmem [#allocation4], %s4153_s8 }
  0x44   : > { %s222_s28 = sshll.u32 %s212_s22, 4  ;;  %s209_s29 = scalar_lea.sflag [#allocation5], %s208_s9  ;;  %s223_s28 = int_to_ptr.vmem [resolvable:$true] %s222_s28 }
  0x45   : > { %p4363_p6 = pneg %p4648_p11  ;;  %s4374_s30 = scalar_lea.vmem %s223_s28, 192 }
  0x46   : > { %p4375_p3 = scmp.ne.s32.totalorder %s223_s28, %s4374_s30  ;;  %s4484_s10 = smov [#allocation4]  }
  0x47   : > { %s4379_s1 = sshll.u32 %s4484_s10, 4  ;;  %s4380_s1 = int_to_ptr.vmem [resolvable:$false] %s4379_s1 }
  0x48   : > { %p4377_p5 = pnand %p4375_p3, %p4363_p6  ;;  %s4381_s2 = scalar_lea.vmem %s4380_s1, 384 }
  0x49   : > { %p4382_p2 = scmp.lt.s32.totalorder %s223_s28, %s4380_s1  ;;  %p4383_p8 = scmp.lt.s32.totalorder %s4381_s2, %s4374_s30 }
  0x4a   : > { %p4378_p4 = pneg %p4377_p5 }
  0x4b   : > { %p4384_p12 = por %p4383_p8, %p4382_p2 }
  0x4d   : > { %p4385_p7 = pnand %p4384_p12, %p4378_p4 }
  0x4f   : > { %4388 = shalt.err (!%p4385_p7)
}
  0x50   : > { %4185 = dma.hbm_to_vmem [thread:$0]  (!%p4648_p11), %s220_s21, 192, %s223_s28, %s209_s29  }
  0x51   : > { %p5228_p10 = scmp.ne.s32.totalorder %s5221_s27, 0 }
  0x52   : > { %s4665_s5 = sand.u32 (!%p5228_p10), 1, %s4461_s16   ;;  %p5229_p0 = scmp.ne.s32.totalorder (!%p5228_p10), %s5219_s25, 0 }
  0x53   : > { %231 = sbr.rel (%p5228_p10) target bundleno = 884 (0x374), region = 36  ;;  %s234_s8 = scalar_lea.sflag (!%p5228_p10), [#allocation5], %s4665_s5 }
  0x54   : > { %s4155_s9 = smul.u32 (!%p5228_p10), 12, %s4665_s5 }
  0x56   : > { %s4669_s11 = scalar_lea.vmem (!%p5228_p10), [#allocation4], %s4155_s9 }
  0x58   : > { %4440 = dma.done.wait (%p5229_p0), %s234_s8, 192  }
  0x59   : > { %4442 = vsyncadd (%p5229_p0), %s234_s8, 4294967104  ;;  %p5230_p9 = scmp.ne.s32.totalorder %s5217_s23, 0 }
  0x5b   : > { %4444 = dma.done.wait (%p5230_p9), [#allocation8], 384  }
  0x5c   : > { %4446 = vsyncadd (%p5230_p9), [#allocation8], 4294966912 }
  0x5d   : > { %4448 = dma.done.wait (%p5230_p9), [#allocation11], 256  }
  0x5e   : > { %4450 = vsyncadd (%p5230_p9), [#allocation11], 4294967040  ;;  %v4485_v0 = vmov 0.0   ;;  %v430_v1 = vld [vmem:[%s4669_s11 + $0x8] sm:$0xf]  ;;  %v429_v2 = vld [vmem:[%s4669_s11] sm:$0xff] }
  0x5f   : > { %3916 = vmatprep.subr.mxu1 %v4485_v0  ;;  %543 = vmatprep.mubr.f32.mxu0 %v4485_v0  ;;  %s4486_s1 = smov 90   ;;  %v433_v3 = vcombine.high %v429_v2, %v429_v2  ;;  %280 = vst [vmem:[#allocation2] sm:$0xf] %v429_v2  ;;  %v389_v4 = vld [vmem:[%s4669_s11 + $0x8] sm:$0xf]  ;;  %vm282_vm0 = vcmask 257024   ;;  %v412_v7 = vcombine.low %v429_v2, %v429_v2 }
  0x60   : > { %438 = vrot.lane.b32.xlu0 %v430_v1, %s4486_s1  ;;  %434 = vrot.lane.b32.xlu1 %v429_v2, %s4486_s1  ;;  %v276_v5 = vld [vmem:[%s4669_s11 + $0x8] sm:$0xf]  ;;  %s4487_s2 = smov 91   ;;  %s4488_s23 = smov 92   ;;  %vm4494_vm1 = vmmov 0   ;;  %vm440_vm2 = vcmask 736256  }
  0x61   : > { %281 = vst [vmem:[#allocation2 + $0x8] sm:$0xf] %v433_v3  ;;  %283 = vst.msk [vmem:[#allocation2 + $0x10] sm:$0xf] %vm282_vm0, %v276_v5  ;;  %v4279_v6 = vld [vmem:[%s4669_s11 + $0x8] ss:$0 sps:$4 sm:$0xff]   ;;  %3926 = vmatprep.mubr.msk.f32.mxu1 %vm4494_vm1, %v4485_v0 }
  0x62   : > { %s4489_s25 = smov 109   ;;  %v348_v8 = vld [vmem:[%s4669_s11 + $0x8] sm:$0xf]  ;;  %s4490_s27 = smov 108   ;;  %vm399_vm3 = vcmask 752640   ;;  %vm469_vm4 = vcmask 1043456  }
  0x63   : > { %v4280_v9 = vld [vmem:[%s4669_s11 + $0x8] ss:$0 sps:$4 sm:$0xff]   ;;  %s4491_s12 = smov 126   ;;  %s4492_s13 = smov 110   ;;  %vm304_vm5 = vcmask 261124   ;;  %vm420_vm6 = vcmask 744448  }
  0x64   : > { %416 = vrot.lane.b32.xlu1 %v429_v2, %s4487_s2  ;;  %397 = vrot.lane.b32.xlu0 %v389_v4, %s4488_s23  ;;  %v307_v10 = vld [vmem:[%s4669_s11 + $0x8] sm:$0xf]  ;;  %s4493_s14 = smov 127   ;;  %vm358_vm7 = vcmask 891904   ;;  %vm379_vm8 = vcmask 883712   ;;  %vm317_vm9 = vcmask 1031168  }
  0x65   : > { %v4281_v11 = vld [vmem:[%s4669_s11 + $0x8] ss:$0 sps:$4 sm:$0xff]   ;;  %vm338_vm10 = vcmask 900096   ;;  %vm296_vm11 = vcmask 1039360   ;;  %v449_v5 = vld [vmem:[#allocation7] sm:$0xff]  ;;  %vm465_vm12 = vcmask 293888  }
  0x66   : > { %v4282_v12 = vld [vmem:[%s4669_s11 + $0x8] ss:$0 sps:$4 sm:$0xff]   ;;  %vm622_vm13 = vcmask 261120   ;;  %vm632_vm14 = vcmask 130048   ;;  %s4495_s21 = smov 2   ;;  %s4496_s22 = smov 74  }
  0x67   : > { %s4497_s28 = smov 56   ;;  %s4498_s29 = smov 38   ;;  %vm1940_vm15 = vcmask 15360  }
  0x68   : > { %436 = vrot.lane.b32.xlu0 %v433_v3, %s4486_s1  ;;  %395 = vrot.lane.b32.xlu1 %v433_v3, %s4488_s23  ;;  %s4499_s30 = smov 20   ;;  %s4500_s10 = smov 112  }
  0x69   : > { %s4501_s9 = smov 94   ;;  %s4502_s8 = smov 76  }
  0x6a   : > { %s4503_s11 = smov 58   ;;  %s4504_s1 = smov 40  }
  0x6c   : > { %418 = vrot.lane.b32.xlu0 %v4279_v6, %s4487_s2  ;;  %393 = vrot.lane.b32.xlu1 %v429_v2, %s4488_s23  ;;  %v4731_v6 = vld [vmem:[#allocation9 + $0x8] sm:$0xff] }
  0x70   : > { %414 = vrot.lane.b32.xlu0 %v412_v7, %s4487_s2  ;;  %354 = vrot.lane.b32.xlu1 %v433_v3, %s4489_s25  ;;  %s4505_s2 = smov 22  }
  0x74   : > { %356 = vrot.lane.b32.xlu0 %v348_v8, %s4489_s25  ;;  %375 = vrot.lane.b32.xlu1 %v429_v2, %s4490_s27  ;;  %v4735_v8 = vld [vmem:[#allocation9] sm:$0xff] }
  0x78   : > { %377 = vrot.lane.b32.xlu0 %v4280_v9, %s4490_s27  ;;  %352 = vrot.lane.b32.xlu1 %v429_v2, %s4489_s25  ;;  %v4743_v9 = vld [vmem:[#allocation10] sm:$0xff]  ;;  %s4507_s25 = smov 114  }
  0x7c   : > { %373 = vrot.lane.b32.xlu0 %v412_v7, %s4490_s27  ;;  %313 = vrot.lane.b32.xlu1 %v433_v3, %s4491_s12  ;;  %s3770_s27 = sshll.u32 %s4665_s5, 6 }
  0x80   : > { %315 = vrot.lane.b32.xlu0 %v307_v10, %s4491_s12  ;;  %334 = vrot.lane.b32.xlu1 %v429_v2, %s4492_s13 }
  0x84   : > { %336 = vrot.lane.b32.xlu0 %v4281_v11, %s4492_s13  ;;  %311 = vrot.lane.b32.xlu1 %v429_v2, %s4491_s12  ;;  %s4976_s12 = scalar_lea.vmem [#allocation12], %s3770_s27 }
  0x88   : > { %332 = vrot.lane.b32.xlu0 %v412_v7, %s4492_s13  ;;  %292 = vrot.lane.b32.xlu1 %v429_v2, %s4493_s14 }
  0x8c   : > { %294 = vrot.lane.b32.xlu0 %v4282_v12, %s4493_s14  ;;  %290 = vrot.lane.b32.xlu1 %v412_v7, %s4493_s14  ;;  %v4733_v7 = vld [vmem:[#allocation10 + $0x8] sm:$0xff]  ;;  %s3642_s14 = sshll.u32 %s4976_s12, 4  ;;  %s5152_s14 = int_to_ptr.vmem [resolvable:$true] %s3642_s14 }
  0xd2   : > { %v439_v13 = vpop.permute.xlu0 %438  ;;  %v435_v14 = vpop.permute.xlu1 %434 }
  0xd3   : > { %448 = vst.msk [vmem:[#allocation2 + $0x70] sm:$0xf] %vm282_vm0, %v439_v13 }
  0xd6   : > { %v417_v15 = vpop.permute.xlu1 %416  ;;  %v398_v16 = vpop.permute.xlu0 %397 }
  0xd7   : > { %407 = vst.msk [vmem:[#allocation2 + $0x58] sm:$0xf] %vm282_vm0, %v398_v16 }
  0xda   : > { %v437_v17 = vpop.permute.xlu0 %436  ;;  %v396_v18 = vpop.permute.xlu1 %395  ;;  %v464_v19 = vld [vmem:[#allocation2 + $0x70] sm:$0xf] }
  0xdb   : > { %v441_v20 = vsel %vm440_vm2, %v435_v14, %v437_v17  ;;  %v442_v21 = vsel %vm440_vm2, %v437_v17, %v439_v13  ;;  %v401_v22 = vsel %vm399_vm3, %v396_v18, %v398_v16  ;;  %3917 = vmatpush3.msk.msra.mxu1 %vm469_vm4, %v464_v19  ;;  %vm803_vm2 = vcmask 253952  }
  0xdc   : > { %446 = vst [vmem:[#allocation2 + $0x60] sm:$0xf] %v441_v20  ;;  %447 = vst [vmem:[#allocation2 + $0x68] sm:$0xf] %v442_v21  ;;  %3918 = vmatprep.subr.mxu1 %v4485_v0 }
  0xdd   : > { %406 = vst [vmem:[#allocation2 + $0x50] sm:$0xf] %v401_v22 }
  0xde   : > { %v419_v23 = vpop.permute.xlu0 %418  ;;  %v394_v24 = vpop.permute.xlu1 %393 }
  0xdf   : > { %v422_v25 = vsel %vm420_vm6, %v417_v15, %v419_v23  ;;  %428 = vst.msk [vmem:[#allocation2 + $0x58] sm:$0xf0] %vm304_vm5, %v419_v23  ;;  %v400_v26 = vsel %vm399_vm3, %v394_v24, %v396_v18 }
  0xe0   : > { %427 = vst [vmem:[#allocation2 + $0x50] sm:$0xf0] %v422_v25  ;;  %405 = vst [vmem:[#allocation2 + $0x48] sm:$0xf] %v400_v26 }
  0xe2   : > { %v415_v27 = vpop.permute.xlu0 %414  ;;  %v355_v28 = vpop.permute.xlu1 %354 }
  0xe3   : > { %v421_v29 = vsel %vm420_vm6, %v415_v27, %v417_v15  ;;  %v463_v30 = vld [vmem:[#allocation2 + $0x68] sm:$0xf]  ;;  %v462_v31 = vld [vmem:[#allocation2 + $0x60] sm:$0xf] }
  0xe4   : > { %426 = vst [vmem:[#allocation2 + $0x48] sm:$0xf0] %v421_v29  ;;  %3771 = vmatprep.subr.msk.mxu0 %vm469_vm4, %v463_v30 }
  0xe5   : > { %3772 = vmatpush1.msk.msra.mxu0 %vm469_vm4, %v462_v31 }
  0xe6   : > { %v357_v32 = vpop.permute.xlu0 %356  ;;  %v376_v33 = vpop.permute.xlu1 %375  ;;  %v461_v34 = vld [vmem:[#allocation2 + $0x58] sm:$0xff] }
  0xe7   : > { %v360_v35 = vsel %vm358_vm7, %v355_v28, %v357_v32  ;;  %366 = vst.msk [vmem:[#allocation2 + $0x40] sm:$0xf] %vm282_vm0, %v357_v32  ;;  %3919 = vmatpush3.msra.mxu1 %v461_v34  ;;  %v460_v36 = vld [vmem:[#allocation2 + $0x50] sm:$0xff] }
  0xe8   : > { %365 = vst [vmem:[#allocation2 + $0x38] sm:$0xf] %v360_v35  ;;  %503 = vmatprep.subr.mxu0 %v460_v36  ;;  %3920 = vmatprep.subr.mxu1 %v4485_v0 }
  0xea   : > { %v378_v37 = vpop.permute.xlu0 %377  ;;  %v353_v38 = vpop.permute.xlu1 %352 }
  0xeb   : > { %v381_v39 = vsel %vm379_vm8, %v376_v33, %v378_v37  ;;  %387 = vst.msk [vmem:[#allocation2 + $0x40] sm:$0xf0] %vm304_vm5, %v378_v37  ;;  %v359_v40 = vsel %vm358_vm7, %v353_v38, %v355_v28  ;;  %v459_v41 = vld [vmem:[#allocation2 + $0x48] sm:$0xff] }
  0xec   : > { %386 = vst [vmem:[#allocation2 + $0x38] sm:$0xf0] %v381_v39  ;;  %364 = vst [vmem:[#allocation2 + $0x30] sm:$0xf] %v359_v40  ;;  %504 = vmatpush1.msra.mxu0 %v459_v41 }
  0xee   : > { %v374_v42 = vpop.permute.xlu0 %373  ;;  %v314_v43 = vpop.permute.xlu1 %313 }
  0xef   : > { %v380_v44 = vsel %vm379_vm8, %v374_v42, %v376_v33 }
  0xf0   : > { %385 = vst [vmem:[#allocation2 + $0x30] sm:$0xf0] %v380_v44 }
  0xf2   : > { %v316_v45 = vpop.permute.xlu0 %315  ;;  %v335_v46 = vpop.permute.xlu1 %334  ;;  %v458_v47 = vld [vmem:[#allocation2 + $0x40] sm:$0xff] }
  0xf3   : > { %v319_v48 = vsel %vm317_vm9, %v314_v43, %v316_v45  ;;  %325 = vst.msk [vmem:[#allocation2 + $0x28] sm:$0xf] %vm282_vm0, %v316_v45  ;;  %3921 = vmatpush3.msra.mxu1 %v458_v47  ;;  %v457_v49 = vld [vmem:[#allocation2 + $0x38] sm:$0xff]  ;;  %vm3254_vm0 = vcmask 31744  }
  0xf4   : > { %324 = vst [vmem:[#allocation2 + $0x20] sm:$0xf] %v319_v48  ;;  %505 = vmatprep.subr.mxu0 %v457_v49  ;;  %3922 = vmatprep.subr.mxu1 %v4485_v0 }
  0xf6   : > { %v337_v50 = vpop.permute.xlu0 %336  ;;  %v312_v51 = vpop.permute.xlu1 %311 }
  0xf7   : > { %v340_v52 = vsel %vm338_vm10, %v335_v46, %v337_v50  ;;  %346 = vst.msk [vmem:[#allocation2 + $0x28] sm:$0xf0] %vm304_vm5, %v337_v50  ;;  %v318_v53 = vsel %vm317_vm9, %v312_v51, %v314_v43  ;;  %v456_v54 = vld [vmem:[#allocation2 + $0x30] sm:$0xff] }
  0xf8   : > { %345 = vst [vmem:[#allocation2 + $0x20] sm:$0xf0] %v340_v52  ;;  %323 = vst [vmem:[#allocation2 + $0x18] sm:$0xf] %v318_v53  ;;  %506 = vmatpush1.msra.mxu0 %v456_v54 }
  0xfa   : > { %v333_v55 = vpop.permute.xlu0 %332  ;;  %v293_v56 = vpop.permute.xlu1 %292 }
  0xfb   : > { %v339_v57 = vsel %vm338_vm10, %v333_v55, %v335_v46 }
  0xfc   : > { %344 = vst [vmem:[#allocation2 + $0x18] sm:$0xf0] %v339_v57 }
  0xfe   : > { %v295_v58 = vpop.permute.xlu0 %294  ;;  %v291_v59 = vpop.permute.xlu1 %290  ;;  %v455_v60 = vld [vmem:[#allocation2 + $0x28] sm:$0xff] }
  0xff   : > { %v298_v61 = vsel %vm296_vm11, %v293_v56, %v295_v58  ;;  %305 = vst.msk [vmem:[#allocation2 + $0x10] sm:$0xf0] %vm304_vm5, %v295_v58  ;;  %v297_v62 = vsel %vm296_vm11, %v291_v59, %v293_v56  ;;  %3923 = vmatpush3.msra.mxu1 %v455_v60  ;;  %v454_v63 = vld [vmem:[#allocation2 + $0x20] sm:$0xff] }
 0x100   : > { %303 = vst [vmem:[#allocation2 + $0x8] sm:$0xf0] %v298_v61  ;;  %302 = vst [vmem:[#allocation2] sm:$0xf0] %v297_v62  ;;  %507 = vmatprep.subr.mxu0 %v454_v63  ;;  %3924 = vmatprep.subr.mxu1 %v4485_v0 }
 0x103   : > { %v453_v1 = vld [vmem:[#allocation2 + $0x18] sm:$0xff] }
 0x104   : > { %508 = vmatpush1.msra.mxu0 %v453_v1 }
 0x106   : > { %v452_v2 = vld [vmem:[#allocation2 + $0x10] sm:$0xff] }
 0x107   : > { %3925 = vmatpush3.msra.mxu1 %v452_v2  ;;  %v451_v3 = vld [vmem:[#allocation2 + $0x8] sm:$0xff]  ;;  %v450_v4 = vld [vmem:[#allocation2] sm:$0xff] }
 0x108   : > { %509 = vmatprep.subr.mxu0 %v451_v3  ;;  %3927 = vmatmul.mubr.msk.f32.vlgmr.msra.gmra.mxu1 %vm465_vm12, %v449_v5 }
 0x109   : > { %510 = vmatpush1.msra.mxu0 %v450_v4  ;;  %3936 = vmatprep.subr.mxu1 %v4485_v0 }
 0x10a   : > { %3773 = vmatmul.mubr.msk.f32.vlgmr.msra.gmra.mxu0 %vm465_vm12, %v449_v5  ;;  %3929 = vmatprep.subr.mxu0 %v4485_v0 }
 0x10b   : > { %3940 = vmatprep.mubr.msk.f32.mxu1 %vm4494_vm1, %v4485_v0  ;;  %3933 = vmatprep.mubr.msk.f32.mxu0 %vm4494_vm1, %v4485_v0 }
 0x10c   : > { %3937 = vmatpush3.msra.mxu1 %v4731_v6  ;;  %3930 = vmatpush3.msra.mxu0 %v4733_v7 }
 0x10d   : > { %3938 = vmatprep.subr.mxu1 %v4485_v0  ;;  %3931 = vmatprep.subr.mxu0 %v4485_v0 }
 0x10e   : > { %3939 = vmatpush3.msra.mxu1 %v4735_v8  ;;  %3932 = vmatpush3.msra.mxu0 %v4743_v9 }
 0x10f   : > { %3950 = vmatprep.subr.mxu1 %v4485_v0  ;;  %3943 = vmatprep.subr.mxu0 %v4485_v0 }
 0x1c8   : > { %v616_v10 = vpop.f32.mrf.mxu1 }
 0x1c9   : > { %623 = vst.msk [vmem:[#allocation3 + $0x10] sm:$0xff] %vm622_vm13, %v616_v10 }
 0x1ca   : > { %v545_v11 = vpop.f32.mrf.mxu0  ;;  %v3928_v12 = vpop.f32.mrf.mxu1 }
 0x1cb   : > { %620 = vst [vmem:[#allocation3] sm:$0xff] %v545_v11 }
 0x1cc   : > { %v547_v13 = vpop.f32.mrf.mxu0 }
 0x1cd   : > { %621 = vst [vmem:[#allocation3 + $0x8] sm:$0xff] %v547_v13 }
 0x1d0   : > { %v3245_v57 = vld [vmem:[#allocation3 + $0x10] sm:$0xf0]  ;;  %v3243_v1 = vld [vmem:[#allocation3 + $0x10] sm:$0xf] }
 0x1d1   : > { %v3249_v61 = vrot.slane %v3245_v57, 4  ;;  %v3441_v2 = vld [vmem:[#allocation3 + $0x10] sm:$0xf0]  ;;  %v3440_v4 = vld [vmem:[#allocation3 + $0x10] sm:$0xf] }
 0x1d2   : > { %v1928_v14 = vld [vmem:[#allocation3] sm:$0xf]  ;;  %v629_v17 = vld [vmem:[#allocation3] sm:$0xf0]  ;;  %v3443_v3 = vrot.slane %v3441_v2, 4 }
 0x1d3   : > { %v812_v15 = vld [vmem:[#allocation3] sm:$0xf]  ;;  %2016 = vrot.lane.b32.xlu0 %v1928_v14, %s4495_s21  ;;  %v813_v18 = vld [vmem:[#allocation3] sm:$0xf0]  ;;  %v631_v19 = vrot.slane %v629_v17, 4 }
 0x1d4   : > { %v628_v16 = vld [vmem:[#allocation3] sm:$0xf]  ;;  %891 = vrot.lane.b32.xlu1 %v812_v15, %s4492_s13  ;;  %v815_v20 = vrot.slane %v813_v18, 4  ;;  %v999_v22 = vld [vmem:[#allocation3] sm:$0xf0] }
 0x1d5   : > { %3941 = vmatmul.mubr.msk.f32.vlgmr.msra.gmra.mxu1 %vm632_vm14, %v628_v16  ;;  %3934 = vmatmul.mubr.msk.f32.vlgmr.msra.gmra.mxu0 %vm632_vm14, %v631_v19  ;;  %v998_v21 = vld [vmem:[#allocation3] sm:$0xf]  ;;  %v1001_v23 = vrot.slane %v999_v22, 4  ;;  %v1185_v25 = vld [vmem:[#allocation3] sm:$0xf0] }
 0x1d6   : > { %3951 = vmatpush3.msra.mxu1 %v4731_v6  ;;  %3954 = vmatprep.mubr.msk.f32.mxu1 %vm4494_vm1, %v4485_v0  ;;  %v1184_v24 = vld [vmem:[#allocation3] sm:$0xf]  ;;  %v1187_v26 = vrot.slane %v1185_v25, 4  ;;  %v1371_v28 = vld [vmem:[#allocation3] sm:$0xf0] }
 0x1d7   : > { %3952 = vmatprep.subr.mxu1 %v4485_v0  ;;  %816 = vrot.lane.b32.xlu0 %v815_v20, %s4492_s13  ;;  %v1370_v27 = vld [vmem:[#allocation3] sm:$0xf]  ;;  %v1373_v29 = vrot.slane %v1371_v28, 4  ;;  %v1557_v31 = vld [vmem:[#allocation3] sm:$0xf0]  ;;  %s3813_s13 = sshll.u32 %s4469_s18, 10 }
 0x1d8   : > { %1077 = vrot.lane.b32.xlu1 %v998_v21, %s4488_s23  ;;  %3953 = vmatpush3.msra.mxu1 %v4735_v8  ;;  %v1556_v30 = vld [vmem:[#allocation3] sm:$0xf]  ;;  %v1559_v32 = vrot.slane %v1557_v31, 4  ;;  %v1743_v34 = vld [vmem:[#allocation3] sm:$0xf0]  ;;  %s3627_s18 = scalar_lea.sflag [#allocation6], %s4665_s5 }
 0x1d9   : > { %3944 = vmatpush3.msra.mxu0 %v4733_v7  ;;  %3964 = vmatprep.subr.mxu1 %v4485_v0  ;;  %v1742_v33 = vld [vmem:[#allocation3] sm:$0xf]  ;;  %v1745_v35 = vrot.slane %v1743_v34, 4  ;;  %v1929_v36 = vld [vmem:[#allocation3 + $0x8] sm:$0xf] }
 0x1da   : > { %3945 = vmatprep.subr.mxu0 %v4485_v0  ;;  %3947 = vmatprep.mubr.msk.f32.mxu0 %vm4494_vm1, %v4485_v0  ;;  %v1930_v37 = vld [vmem:[#allocation3] sm:$0xf0]  ;;  %v2126_v39 = vld [vmem:[#allocation3 + $0x8] sm:$0xf]  ;;  %v2127_v40 = vld [vmem:[#allocation3 + $0x8] sm:$0xf0] }
 0x1db   : > { %3946 = vmatpush3.msra.mxu0 %v4743_v9  ;;  %1002 = vrot.lane.b32.xlu0 %v1001_v23, %s4488_s23  ;;  %v1934_v38 = vrot.slane %v1930_v37, 4  ;;  %v1931_v41 = vld [vmem:[#allocation3 + $0x8] sm:$0xf0]  ;;  %v2129_v42 = vrot.slane %v2127_v40, 4  ;;  %v2312_v46 = vld [vmem:[#allocation3 + $0x8] sm:$0xf] }
 0x1dc   : > { %1263 = vrot.lane.b32.xlu1 %v1184_v24, %s4496_s22  ;;  %3957 = vmatprep.subr.mxu0 %v4485_v0  ;;  %v1935_v43 = vrot.slane %v1931_v41, 4  ;;  %v2313_v44 = vld [vmem:[#allocation3 + $0x8] sm:$0xf0]  ;;  %v2498_v49 = vld [vmem:[#allocation3 + $0x8] sm:$0xf]  ;;  %s4506_s23 = smov 4  }
 0x1dd   : > { %v2315_v45 = vrot.slane %v2313_v44, 4  ;;  %v2499_v47 = vld [vmem:[#allocation3 + $0x8] sm:$0xf0]  ;;  %v2684_v52 = vld [vmem:[#allocation3 + $0x8] sm:$0xf] }
 0x1de   : > { %v2501_v48 = vrot.slane %v2499_v47, 4  ;;  %v2685_v50 = vld [vmem:[#allocation3 + $0x8] sm:$0xf0]  ;;  %v2870_v55 = vld [vmem:[#allocation3 + $0x8] sm:$0xf] }
 0x1df   : > { %1188 = vrot.lane.b32.xlu0 %v1187_v26, %s4496_s22  ;;  %v2687_v51 = vrot.slane %v2685_v50, 4  ;;  %v2871_v53 = vld [vmem:[#allocation3 + $0x8] sm:$0xf0]  ;;  %v3056_v59 = vld [vmem:[#allocation3 + $0x8] sm:$0xf] }
 0x1e0   : > { %1449 = vrot.lane.b32.xlu1 %v1370_v27, %s4497_s28  ;;  %v2873_v54 = vrot.slane %v2871_v53, 4  ;;  %v3057_v56 = vld [vmem:[#allocation3 + $0x8] sm:$0xf0]  ;;  %v3242_v63 = vld [vmem:[#allocation3 + $0x8] sm:$0xf] }
 0x1e1   : > { %v3059_v58 = vrot.slane %v3057_v56, 4  ;;  %v3244_v60 = vld [vmem:[#allocation3 + $0x8] sm:$0xf0]  ;;  %v4508_v41 = vmov 1966171168  }
 0x1e2   : > { %v3248_v62 = vrot.slane %v3244_v60, 4 }
 0x1e3   : > { %1374 = vrot.lane.b32.xlu0 %v1373_v29, %s4497_s28  ;;  %s5150_s28 = scalar_lea.hbm %s5210_s4, %s3813_s13 }
 0x1e4   : > { %1635 = vrot.lane.b32.xlu1 %v1556_v30, %s4498_s29 }
 0x1e7   : > { %1560 = vrot.lane.b32.xlu0 %v1559_v32, %s4498_s29  ;;  %s4389_s29 = scalar_lea.vmem %s5152_s14, 1024 }
 0x1e8   : > { %1821 = vrot.lane.b32.xlu1 %v1742_v33, %s4499_s30  ;;  %p4390_p1 = scmp.ne.s32.totalorder %s5152_s14, %s4389_s29 }
 0x1ea   : > { %p4391_p11 = pnand %p4390_p1, %p4637_p13 }
 0x1eb   : > { %1746 = vrot.lane.b32.xlu0 %v1745_v35, %s4499_s30  ;;  %s4509_s30 = smov [#allocation12]  }
 0x1ec   : > { %2018 = vrot.lane.b32.xlu1 %v1929_v36, %s4495_s21  ;;  %p4392_p6 = pneg %p4391_p11 }
 0x1ef   : > { %1936 = vrot.lane.b32.xlu0 %v1934_v38, %s4495_s21 }
 0x1f0   : > { %2205 = vrot.lane.b32.xlu1 %v2126_v39, %s4500_s10 }
 0x1f3   : > { %2130 = vrot.lane.b32.xlu0 %v2129_v42, %s4500_s10  ;;  %v780_v42 = vunpack.c.l.s4 %v4508_v41  ;;  %s4393_s10 = sshll.u32 %s4509_s30, 4  ;;  %s4394_s10 = int_to_ptr.vmem [resolvable:$false] %s4393_s10 }
 0x1f4   : > { %1938 = vrot.lane.b32.xlu1 %v1935_v43, %s4495_s21  ;;  %v782_v43 = vlaneseq  ;;  %p4396_p3 = scmp.lt.s32.totalorder %s5152_s14, %s4394_s10 }
 0x1f6   : > { %v783_v47 = vshrl.u32 %v782_v43, 7 }
 0x1f7   : > { %2316 = vrot.lane.b32.xlu0 %v2315_v45, %s4501_s9 }
 0x1f8   : > { %2391 = vrot.lane.b32.xlu1 %v2312_v46, %s4501_s9  ;;  %v781_v46 = vunpack.c.0.s8 %v780_v42  ;;  %s4395_s9 = scalar_lea.vmem %s4394_s10, 2048 }
 0x1f9   : > { %p4397_p5 = scmp.lt.s32.totalorder %s4395_s9, %s4389_s29 }
 0x1fb   : > { %2502 = vrot.lane.b32.xlu0 %v2501_v48, %s4502_s8  ;;  %p4398_p4 = por %p4397_p5, %p4396_p3 }
 0x1fc   : > { %2577 = vrot.lane.b32.xlu1 %v2498_v49, %s4502_s8 }
 0x1fd   : > { %p4399_p2 = pnand %p4398_p4, %p4392_p6 }
 0x1ff   : > { %2688 = vrot.lane.b32.xlu0 %v2687_v51, %s4503_s11  ;;  %v4957_v51 = vsub.s32 %v781_v46, %v783_v47 }
 0x200   : > { %2763 = vrot.lane.b32.xlu1 %v2684_v52, %s4503_s11 }
 0x203   : > { %2874 = vrot.lane.b32.xlu0 %v2873_v54, %s4504_s1 }
 0x204   : > { %2949 = vrot.lane.b32.xlu1 %v2870_v55, %s4504_s1 }
 0x207   : > { %3060 = vrot.lane.b32.xlu0 %v3059_v58, %s4505_s2 }
 0x208   : > { %3135 = vrot.lane.b32.xlu1 %v3056_v59, %s4505_s2 }
 0x20b   : > { %3250 = vrot.lane.b32.xlu0 %v3248_v62, %s4506_s23 }
 0x20c   : > { %3252 = vrot.lane.b32.xlu1 %v3249_v61, %s4506_s23 }
 0x20f   : > { %3330 = vrot.lane.b32.xlu0 %v3242_v63, %s4506_s23 }
 0x210   : > { %3332 = vrot.lane.b32.xlu1 %v3243_v1, %s4506_s23 }
 0x213   : > { %3444 = vrot.lane.b32.xlu0 %v3443_v3, %s4507_s25 }
 0x214   : > { %3519 = vrot.lane.b32.xlu1 %v3440_v4, %s4507_s25 }
 0x245   : > { %v4769_v5 = vpop.permute.xlu0 %2016 }
 0x246   : > { %v892_v10 = vpop.permute.xlu1 %891 }
 0x247   : > { %3955 = vmatmul.mubr.msk.f32.vlgmr.msra.gmra.mxu1 %vm632_vm14, %v892_v10 }
 0x248   : > { %3965 = vmatpush3.msra.mxu1 %v4731_v6  ;;  %3968 = vmatprep.mubr.msk.f32.mxu1 %vm4494_vm1, %v4485_v0 }
 0x249   : > { %3966 = vmatprep.subr.mxu1 %v4485_v0  ;;  %v817_v11 = vpop.permute.xlu0 %816 }
 0x24a   : > { %v1078_v12 = vpop.permute.xlu1 %1077  ;;  %3967 = vmatpush3.msra.mxu1 %v4735_v8  ;;  %3948 = vmatmul.mubr.msk.f32.vlgmr.msra.gmra.mxu0 %vm632_vm14, %v817_v11 }
 0x24b   : > { %3969 = vmatmul.mubr.msk.f32.vlgmr.msra.gmra.mxu1 %vm632_vm14, %v1078_v12  ;;  %3978 = vmatprep.subr.mxu1 %v4485_v0 }
 0x24c   : > { %3958 = vmatpush3.msra.mxu0 %v4733_v7  ;;  %3979 = vmatpush3.msra.mxu1 %v4731_v6 }
 0x24d   : > { %3959 = vmatprep.subr.mxu0 %v4485_v0  ;;  %3980 = vmatprep.subr.mxu1 %v4485_v0  ;;  %v1003_v13 = vpop.permute.xlu0 %1002 }
 0x24e   : > { %v1264_v14 = vpop.permute.xlu1 %1263  ;;  %3960 = vmatpush3.msra.mxu0 %v4743_v9  ;;  %3961 = vmatprep.mubr.msk.f32.mxu0 %vm4494_vm1, %v4485_v0 }
 0x24f   : > { %3981 = vmatpush3.msra.mxu1 %v4735_v8  ;;  %3982 = vmatprep.mubr.msk.f32.mxu1 %vm4494_vm1, %v4485_v0 }
 0x250   : > { %3962 = vmatmul.mubr.msk.f32.vlgmr.msra.gmra.mxu0 %vm632_vm14, %v1003_v13  ;;  %3971 = vmatprep.subr.mxu0 %v4485_v0 }
 0x251   : > { %3983 = vmatmul.mubr.msk.f32.vlgmr.msra.gmra.mxu1 %vm632_vm14, %v1264_v14  ;;  %3992 = vmatprep.subr.mxu1 %v4485_v0  ;;  %v1189_v15 = vpop.permute.xlu0 %1188 }
 0x252   : > { %3972 = vmatpush3.msra.mxu0 %v4733_v7  ;;  %v1450_v16 = vpop.permute.xlu1 %1449  ;;  %3993 = vmatpush3.msra.mxu1 %v4731_v6 }
 0x253   : > { %3973 = vmatprep.subr.mxu0 %v4485_v0  ;;  %3994 = vmatprep.subr.mxu1 %v4485_v0 }
 0x254   : > { %3974 = vmatpush3.msra.mxu0 %v4743_v9  ;;  %3975 = vmatprep.mubr.msk.f32.mxu0 %vm4494_vm1, %v4485_v0 }
 0x255   : > { %3995 = vmatpush3.msra.mxu1 %v4735_v8  ;;  %3996 = vmatprep.mubr.msk.f32.mxu1 %vm4494_vm1, %v4485_v0  ;;  %v1375_v17 = vpop.permute.xlu0 %1374 }
 0x256   : > { %3976 = vmatmul.mubr.msk.f32.vlgmr.msra.gmra.mxu0 %vm632_vm14, %v1189_v15  ;;  %v1636_v18 = vpop.permute.xlu1 %1635  ;;  %3985 = vmatprep.subr.mxu0 %v4485_v0 }
 0x257   : > { %3997 = vmatmul.mubr.msk.f32.vlgmr.msra.gmra.mxu1 %vm632_vm14, %v1450_v16  ;;  %4006 = vmatprep.subr.mxu1 %v4485_v0 }
 0x258   : > { %3986 = vmatpush3.msra.mxu0 %v4733_v7  ;;  %4007 = vmatpush3.msra.mxu1 %v4731_v6 }
 0x259   : > { %3987 = vmatprep.subr.mxu0 %v4485_v0  ;;  %4008 = vmatprep.subr.mxu1 %v4485_v0  ;;  %v1561_v19 = vpop.permute.xlu0 %1560 }
 0x25a   : > { %3988 = vmatpush3.msra.mxu0 %v4743_v9  ;;  %v1822_v20 = vpop.permute.xlu1 %1821  ;;  %3989 = vmatprep.mubr.msk.f32.mxu0 %vm4494_vm1, %v4485_v0 }
 0x25b   : > { %4009 = vmatpush3.msra.mxu1 %v4735_v8  ;;  %4010 = vmatprep.mubr.msk.f32.mxu1 %vm4494_vm1, %v4485_v0 }
 0x25c   : > { %3990 = vmatmul.mubr.msk.f32.vlgmr.msra.gmra.mxu0 %vm632_vm14, %v1375_v17  ;;  %3999 = vmatprep.subr.mxu0 %v4485_v0 }
 0x25d   : > { %4011 = vmatmul.mubr.msk.f32.vlgmr.msra.gmra.mxu1 %vm632_vm14, %v1636_v18  ;;  %4020 = vmatprep.subr.mxu1 %v4485_v0  ;;  %v1747_v21 = vpop.permute.xlu0 %1746 }
 0x25e   : > { %4000 = vmatpush3.msra.mxu0 %v4733_v7  ;;  %v2019_v22 = vpop.permute.xlu1 %2018  ;;  %4021 = vmatpush3.msra.mxu1 %v4731_v6 }
 0x25f   : > { %4001 = vmatprep.subr.mxu0 %v4485_v0  ;;  %4022 = vmatprep.subr.mxu1 %v4485_v0  ;;  %v2020_v25 = vsel %vm1940_vm15, %v4769_v5, %v2019_v22 }
 0x260   : > { %4002 = vmatpush3.msra.mxu0 %v4743_v9  ;;  %4003 = vmatprep.mubr.msk.f32.mxu0 %vm4494_vm1, %v4485_v0 }
 0x261   : > { %4023 = vmatpush3.msra.mxu1 %v4735_v8  ;;  %4024 = vmatprep.mubr.msk.f32.mxu1 %vm4494_vm1, %v4485_v0  ;;  %v1937_v23 = vpop.permute.xlu0 %1936 }
 0x262   : > { %4004 = vmatmul.mubr.msk.f32.vlgmr.msra.gmra.mxu0 %vm632_vm14, %v1561_v19  ;;  %v2206_v24 = vpop.permute.xlu1 %2205  ;;  %4013 = vmatprep.subr.mxu0 %v4485_v0 }
 0x263   : > { %4025 = vmatmul.mubr.msk.f32.vlgmr.msra.gmra.mxu1 %vm632_vm14, %v1822_v20  ;;  %4014 = vmatpush3.msra.mxu0 %v4733_v7 }
 0x264   : > { %4034 = vmatprep.subr.mxu1 %v4485_v0  ;;  %4015 = vmatprep.subr.mxu0 %v4485_v0 }
 0x265   : > { %4035 = vmatpush3.msra.mxu1 %v4731_v6  ;;  %4016 = vmatpush3.msra.mxu0 %v4743_v9  ;;  %v2131_v26 = vpop.permute.xlu0 %2130 }
 0x266   : > { %4017 = vmatprep.mubr.msk.f32.mxu0 %vm4494_vm1, %v4485_v0  ;;  %4036 = vmatprep.subr.mxu1 %v4485_v0  ;;  %v1939_v27 = vpop.permute.xlu1 %1938 }
 0x267   : > { %4018 = vmatmul.mubr.msk.f32.vlgmr.msra.gmra.mxu0 %vm632_vm14, %v1747_v21  ;;  %4037 = vmatpush3.msra.mxu1 %v4735_v8  ;;  %v1941_v28 = vsel %vm1940_vm15, %v1937_v23, %v1939_v27 }
 0x268   : > { %4038 = vmatprep.mubr.msk.f32.mxu1 %vm4494_vm1, %v4485_v0  ;;  %4048 = vmatprep.subr.mxu1 %v4485_v0 }
 0x269   : > { %4039 = vmatmul.mubr.msk.f32.vlgmr.msra.gmra.mxu1 %vm632_vm14, %v2020_v25  ;;  %4027 = vmatprep.subr.mxu0 %v4485_v0  ;;  %v2317_v29 = vpop.permute.xlu0 %2316 }
 0x26a   : > { %4049 = vmatpush3.msra.mxu1 %v4731_v6  ;;  %4052 = vmatprep.mubr.msk.f32.mxu1 %vm4494_vm1, %v4485_v0  ;;  %v2392_v30 = vpop.permute.xlu1 %2391 }
 0x26b   : > { %4050 = vmatprep.subr.mxu1 %v4485_v0  ;;  %4028 = vmatpush3.msra.mxu0 %v4733_v7 }
 0x26c   : > { %4051 = vmatpush3.msra.mxu1 %v4735_v8  ;;  %4029 = vmatprep.subr.mxu0 %v4485_v0 }
 0x26d   : > { %4053 = vmatmul.mubr.msk.f32.vlgmr.msra.gmra.mxu1 %vm632_vm14, %v2206_v24  ;;  %4030 = vmatpush3.msra.mxu0 %v4743_v9  ;;  %v2503_v31 = vpop.permute.xlu0 %2502 }
 0x26e   : > { %4031 = vmatprep.mubr.msk.f32.mxu0 %vm4494_vm1, %v4485_v0  ;;  %4041 = vmatprep.subr.mxu0 %v4485_v0  ;;  %v2578_v32 = vpop.permute.xlu1 %2577 }
 0x26f   : > { %4062 = vmatprep.subr.mxu1 %v4485_v0  ;;  %4032 = vmatmul.mubr.msk.f32.vlgmr.msra.gmra.mxu0 %vm632_vm14, %v1941_v28 }
 0x270   : > { %4063 = vmatpush3.msra.mxu1 %v4731_v6  ;;  %4042 = vmatpush3.msra.mxu0 %v4733_v7 }
 0x271   : > { %4064 = vmatprep.subr.mxu1 %v4485_v0  ;;  %4043 = vmatprep.subr.mxu0 %v4485_v0  ;;  %v2689_v33 = vpop.permute.xlu0 %2688 }
 0x272   : > { %4065 = vmatpush3.msra.mxu1 %v4735_v8  ;;  %4044 = vmatpush3.msra.mxu0 %v4743_v9  ;;  %v2764_v34 = vpop.permute.xlu1 %2763 }
 0x273   : > { %4066 = vmatprep.mubr.msk.f32.mxu1 %vm4494_vm1, %v4485_v0  ;;  %4045 = vmatprep.mubr.msk.f32.mxu0 %vm4494_vm1, %v4485_v0 }
 0x274   : > { %4055 = vmatprep.subr.mxu0 %v4485_v0  ;;  %4067 = vmatmul.mubr.msk.f32.vlgmr.msra.gmra.mxu1 %vm632_vm14, %v2392_v30 }
 0x275   : > { %4076 = vmatprep.subr.mxu1 %v4485_v0  ;;  %4046 = vmatmul.mubr.msk.f32.vlgmr.msra.gmra.mxu0 %vm632_vm14, %v2131_v26  ;;  %v2875_v35 = vpop.permute.xlu0 %2874 }
 0x276   : > { %4077 = vmatpush3.msra.mxu1 %v4731_v6  ;;  %4056 = vmatpush3.msra.mxu0 %v4733_v7  ;;  %v2950_v36 = vpop.permute.xlu1 %2949 }
 0x277   : > { %4078 = vmatprep.subr.mxu1 %v4485_v0  ;;  %4057 = vmatprep.subr.mxu0 %v4485_v0 }
 0x278   : > { %4079 = vmatpush3.msra.mxu1 %v4735_v8  ;;  %4058 = vmatpush3.msra.mxu0 %v4743_v9 }
 0x279   : > { %4080 = vmatprep.mubr.msk.f32.mxu1 %vm4494_vm1, %v4485_v0  ;;  %4059 = vmatprep.mubr.msk.f32.mxu0 %vm4494_vm1, %v4485_v0  ;;  %v3061_v37 = vpop.permute.xlu0 %3060 }
 0x27a   : > { %4069 = vmatprep.subr.mxu0 %v4485_v0  ;;  %4081 = vmatmul.mubr.msk.f32.vlgmr.msra.gmra.mxu1 %vm632_vm14, %v2578_v32  ;;  %v3136_v38 = vpop.permute.xlu1 %3135 }
 0x27b   : > { %4090 = vmatprep.subr.mxu1 %v4485_v0  ;;  %4060 = vmatmul.mubr.msk.f32.vlgmr.msra.gmra.mxu0 %vm632_vm14, %v2317_v29 }
 0x27c   : > { %4091 = vmatpush3.msra.mxu1 %v4731_v6  ;;  %4070 = vmatpush3.msra.mxu0 %v4733_v7 }
 0x27d   : > { %4092 = vmatprep.subr.mxu1 %v4485_v0  ;;  %4071 = vmatprep.subr.mxu0 %v4485_v0  ;;  %v3251_v39 = vpop.permute.xlu0 %3250 }
 0x27e   : > { %4093 = vmatpush3.msra.mxu1 %v4735_v8  ;;  %4072 = vmatpush3.msra.mxu0 %v4743_v9  ;;  %v3253_v40 = vpop.permute.xlu1 %3252 }
 0x27f   : > { %4094 = vmatprep.mubr.msk.f32.mxu1 %vm4494_vm1, %v4485_v0  ;;  %4073 = vmatprep.mubr.msk.f32.mxu0 %vm4494_vm1, %v4485_v0  ;;  %v3255_v49 = vsel %vm3254_vm0, %v3251_v39, %v3253_v40 }
 0x280   : > { %4083 = vmatprep.subr.mxu0 %v4485_v0  ;;  %4095 = vmatmul.mubr.msk.f32.vlgmr.msra.gmra.mxu1 %vm632_vm14, %v2764_v34 }
 0x281   : > { %4104 = vmatprep.subr.mxu1 %v4485_v0  ;;  %4074 = vmatmul.mubr.msk.f32.vlgmr.msra.gmra.mxu0 %vm632_vm14, %v2503_v31  ;;  %v3331_v44 = vpop.permute.xlu0 %3330 }
 0x282   : > { %4105 = vmatpush3.msra.mxu1 %v4731_v6  ;;  %4084 = vmatpush3.msra.mxu0 %v4733_v7  ;;  %v3333_v45 = vpop.permute.xlu1 %3332 }
 0x283   : > { %4106 = vmatprep.subr.mxu1 %v4485_v0  ;;  %4085 = vmatprep.subr.mxu0 %v4485_v0  ;;  %v3334_v48 = vsel %vm3254_vm0, %v3331_v44, %v3333_v45 }
 0x284   : > { %4107 = vmatpush3.msra.mxu1 %v4735_v8  ;;  %4086 = vmatpush3.msra.mxu0 %v4743_v9 }
 0x285   : > { %4108 = vmatprep.mubr.msk.f32.mxu1 %vm4494_vm1, %v4485_v0  ;;  %4087 = vmatprep.mubr.msk.f32.mxu0 %vm4494_vm1, %v4485_v0  ;;  %v3445_v54 = vpop.permute.xlu0 %3444 }
 0x286   : > { %4097 = vmatprep.subr.mxu0 %v4485_v0  ;;  %4109 = vmatmul.mubr.msk.f32.vlgmr.msra.gmra.mxu1 %vm632_vm14, %v2950_v36  ;;  %v3520_v56 = vpop.permute.xlu1 %3519 }
 0x287   : > { %4118 = vmatprep.subr.mxu1 %v4485_v0  ;;  %4088 = vmatmul.mubr.msk.f32.vlgmr.msra.gmra.mxu0 %vm632_vm14, %v2689_v33 }
 0x288   : > { %4119 = vmatpush3.msra.mxu1 %v4731_v6  ;;  %4098 = vmatpush3.msra.mxu0 %v4733_v7 }
 0x289   : > { %4120 = vmatprep.subr.mxu1 %v4485_v0  ;;  %4099 = vmatprep.subr.mxu0 %v4485_v0 }
 0x28a   : > { %4121 = vmatpush3.msra.mxu1 %v4735_v8  ;;  %4100 = vmatpush3.msra.mxu0 %v4743_v9 }
 0x28b   : > { %4122 = vmatprep.mubr.msk.f32.mxu1 %vm4494_vm1, %v4485_v0  ;;  %4101 = vmatprep.mubr.msk.f32.mxu0 %vm4494_vm1, %v4485_v0 }
 0x28c   : > { %4111 = vmatprep.subr.mxu0 %v4485_v0  ;;  %4123 = vmatmul.mubr.msk.f32.vlgmr.msra.gmra.mxu1 %vm632_vm14, %v3136_v38 }
 0x28d   : > { %4102 = vmatmul.mubr.msk.f32.vlgmr.msra.gmra.mxu0 %vm632_vm14, %v2875_v35  ;;  %4132 = vmatprep.subr.mxu1 %v4485_v0 }
 0x28e   : > { %4112 = vmatpush3.msra.mxu0 %v4733_v7  ;;  %4115 = vmatprep.mubr.msk.f32.mxu0 %vm4494_vm1, %v4485_v0 }
 0x28f   : > { %4113 = vmatprep.subr.mxu0 %v4485_v0  ;;  %4133 = vmatpush3.msra.mxu1 %v4731_v6 }
 0x290   : > { %4114 = vmatpush3.msra.mxu0 %v4743_v9  ;;  %4134 = vmatprep.subr.mxu1 %v4485_v0 }
 0x291   : > { %4125 = vmatprep.subr.mxu0 %v4485_v0  ;;  %4116 = vmatmul.mubr.msk.f32.vlgmr.msra.gmra.mxu0 %vm632_vm14, %v3061_v37 }
 0x292   : > { %4126 = vmatpush3.msra.mxu0 %v4733_v7  ;;  %4135 = vmatpush3.msra.mxu1 %v4735_v8 }
 0x293   : > { %4127 = vmatprep.subr.mxu0 %v4485_v0  ;;  %4129 = vmatprep.mubr.msk.f32.mxu0 %vm4494_vm1, %v4485_v0 }
 0x294   : > { %4128 = vmatpush3.msra.mxu0 %v4743_v9  ;;  %4136 = vmatprep.mubr.msk.f32.mxu1 %vm4494_vm1, %v4485_v0 }
 0x295   : > { %4139 = vmatprep.subr.mxu0 %v4485_v0  ;;  %v774_v50 = vpop.f32.mrf.mxu1  ;;  %4146 = vmatprep.subr.mxu1 %v4485_v0  ;;  %v701_v52 = vpop.f32.mrf.mxu0 }
 0x296   : > { %4130 = vmatmul.mubr.msk.f32.vlgmr.msra.gmra.mxu0 %vm632_vm14, %v3255_v49  ;;  %4137 = vmatmul.mubr.msk.f32.vlgmr.msra.gmra.mxu1 %vm632_vm14, %v3334_v48  ;;  %v775_v55 = vadd.f32 %v774_v50, %v701_v52 }
 0x297   : > { %4140 = vmatpush3.msra.mxu0 %v4733_v7  ;;  %v3942_v53 = vpop.f32.mrf.mxu1  ;;  %4147 = vmatpush3.msra.mxu1 %v4731_v6  ;;  %v3935_v57 = vpop.f32.mrf.mxu0 }
 0x298   : > { %4141 = vmatprep.subr.mxu0 %v4485_v0  ;;  %4148 = vmatprep.subr.mxu1 %v4485_v0  ;;  %v785_v7 = vrot.slane %v775_v55, %v4957_v51 }
 0x299   : > { %4142 = vmatpush3.msra.mxu0 %v4743_v9  ;;  %4149 = vmatpush3.msra.mxu1 %v4735_v8 }
 0x29a   : > { %4143 = vmatprep.mubr.msk.f32.mxu0 %vm4494_vm1, %v4485_v0  ;;  %4150 = vmatprep.mubr.msk.f32.mxu1 %vm4494_vm1, %v4485_v0  ;;  %v786_v6 = vcombine.high %v785_v7, %v785_v7  ;;  %v793_v9 = vrot.slane %v785_v7, %v4957_v51 }
 0x29b   : > { %4144 = vmatmul.mubr.msk.f32.vlgmr.msra.gmra.mxu0 %vm632_vm14, %v3445_v54  ;;  %4151 = vmatmul.mubr.msk.f32.vlgmr.msra.gmra.mxu1 %vm632_vm14, %v3520_v56 }
 0x29c   : > { %v800_v58 = vrot.slane %v786_v6, %v4957_v51  ;;  %804 = vst.msk [vmem:[%s4976_s12] sm:$0x1] %vm803_vm2, %v793_v9  ;;  %v806_v8 = vcombine.high %v793_v9, %v793_v9 }
 0x29e   : > { %805 = vst.msk [vmem:[%s4976_s12 + $0x20] sm:$0x1] %vm803_vm2, %v800_v58  ;;  %v807_v0 = vcombine.high %v800_v58, %v800_v58  ;;  %810 = vst.msk [vmem:[%s4976_s12 + $0x1] sm:$0x1] %vm803_vm2, %v806_v8 }
 0x2a0   : > { %811 = vst.msk [vmem:[%s4976_s12 + $0x21] sm:$0x1] %vm803_vm2, %v807_v0 }
 0x307   : > { %v961_v59 = vpop.f32.mrf.mxu1 }
 0x309   : > { %v3956_v60 = vpop.f32.mrf.mxu1 }
 0x30a   : > { %v886_v61 = vpop.f32.mrf.mxu0 }
 0x30b   : > { %v1147_v62 = vpop.f32.mrf.mxu1  ;;  %v962_v63 = vadd.f32 %v961_v59, %v886_v61 }
 0x30c   : > { %v3949_v1 = vpop.f32.mrf.mxu0 }
 0x30d   : > { %v3970_v2 = vpop.f32.mrf.mxu1  ;;  %v972_v3 = vrot.slane %v962_v63, %v4957_v51 }
 0x30f   : > { %v973_v4 = vcombine.high %v972_v3, %v972_v3  ;;  %v980_v5 = vrot.slane %v972_v3, %v4957_v51 }
 0x310   : > { %v1072_v10 = vpop.f32.mrf.mxu0 }
 0x311   : > { %v1148_v11 = vadd.f32 %v1147_v62, %v1072_v10  ;;  %v1333_v12 = vpop.f32.mrf.mxu1  ;;  %v987_v13 = vrot.slane %v973_v4, %v4957_v51  ;;  %990 = vst.msk [vmem:[%s4976_s12 + $0x2] sm:$0x1] %vm803_vm2, %v980_v5  ;;  %v992_v14 = vcombine.high %v980_v5, %v980_v5 }
 0x312   : > { %v3963_v15 = vpop.f32.mrf.mxu0 }
 0x313   : > { %v1158_v16 = vrot.slane %v1148_v11, %v4957_v51  ;;  %v3984_v17 = vpop.f32.mrf.mxu1  ;;  %991 = vst.msk [vmem:[%s4976_s12 + $0x22] sm:$0x1] %vm803_vm2, %v987_v13  ;;  %v993_v18 = vcombine.high %v987_v13, %v987_v13  ;;  %996 = vst.msk [vmem:[%s4976_s12 + $0x3] sm:$0x1] %vm803_vm2, %v992_v14 }
 0x315   : > { %v1159_v19 = vcombine.high %v1158_v16, %v1158_v16  ;;  %v1166_v20 = vrot.slane %v1158_v16, %v4957_v51  ;;  %997 = vst.msk [vmem:[%s4976_s12 + $0x23] sm:$0x1] %vm803_vm2, %v993_v18 }
 0x316   : > { %v1258_v21 = vpop.f32.mrf.mxu0 }
 0x317   : > { %v1173_v22 = vrot.slane %v1159_v19, %v4957_v51  ;;  %1176 = vst.msk [vmem:[%s4976_s12 + $0x4] sm:$0x1] %vm803_vm2, %v1166_v20  ;;  %v1178_v23 = vcombine.high %v1166_v20, %v1166_v20  ;;  %v1334_v24 = vadd.f32 %v1333_v12, %v1258_v21  ;;  %v1519_v25 = vpop.f32.mrf.mxu1 }
 0x318   : > { %v3977_v26 = vpop.f32.mrf.mxu0 }
 0x319   : > { %1177 = vst.msk [vmem:[%s4976_s12 + $0x24] sm:$0x1] %vm803_vm2, %v1173_v22  ;;  %v1179_v27 = vcombine.high %v1173_v22, %v1173_v22  ;;  %1182 = vst.msk [vmem:[%s4976_s12 + $0x5] sm:$0x1] %vm803_vm2, %v1178_v23  ;;  %v1344_v28 = vrot.slane %v1334_v24, %v4957_v51  ;;  %v3998_v29 = vpop.f32.mrf.mxu1 }
 0x31b   : > { %1183 = vst.msk [vmem:[%s4976_s12 + $0x25] sm:$0x1] %vm803_vm2, %v1179_v27  ;;  %v1345_v30 = vcombine.high %v1344_v28, %v1344_v28  ;;  %v1352_v31 = vrot.slane %v1344_v28, %v4957_v51 }
 0x31c   : > { %v1444_v32 = vpop.f32.mrf.mxu0 }
 0x31d   : > { %v1359_v33 = vrot.slane %v1345_v30, %v4957_v51  ;;  %1362 = vst.msk [vmem:[%s4976_s12 + $0x6] sm:$0x1] %vm803_vm2, %v1352_v31  ;;  %v1364_v34 = vcombine.high %v1352_v31, %v1352_v31  ;;  %v1520_v35 = vadd.f32 %v1519_v25, %v1444_v32  ;;  %v1705_v36 = vpop.f32.mrf.mxu1 }
 0x31e   : > { %v3991_v37 = vpop.f32.mrf.mxu0 }
 0x31f   : > { %1363 = vst.msk [vmem:[%s4976_s12 + $0x26] sm:$0x1] %vm803_vm2, %v1359_v33  ;;  %v1365_v38 = vcombine.high %v1359_v33, %v1359_v33  ;;  %1368 = vst.msk [vmem:[%s4976_s12 + $0x7] sm:$0x1] %vm803_vm2, %v1364_v34  ;;  %v1530_v39 = vrot.slane %v1520_v35, %v4957_v51  ;;  %v4012_v40 = vpop.f32.mrf.mxu1 }
 0x321   : > { %1369 = vst.msk [vmem:[%s4976_s12 + $0x27] sm:$0x1] %vm803_vm2, %v1365_v38  ;;  %v1531_v41 = vcombine.high %v1530_v39, %v1530_v39  ;;  %v1538_v42 = vrot.slane %v1530_v39, %v4957_v51 }
 0x322   : > { %v1630_v43 = vpop.f32.mrf.mxu0 }
 0x323   : > { %v1545_v44 = vrot.slane %v1531_v41, %v4957_v51  ;;  %1548 = vst.msk [vmem:[%s4976_s12 + $0x8] sm:$0x1] %vm803_vm2, %v1538_v42  ;;  %v1550_v45 = vcombine.high %v1538_v42, %v1538_v42  ;;  %v1706_v46 = vadd.f32 %v1705_v36, %v1630_v43  ;;  %v1891_v47 = vpop.f32.mrf.mxu1 }
 0x324   : > { %v4005_v48 = vpop.f32.mrf.mxu0 }
 0x325   : > { %1549 = vst.msk [vmem:[%s4976_s12 + $0x28] sm:$0x1] %vm803_vm2, %v1545_v44  ;;  %v1551_v49 = vcombine.high %v1545_v44, %v1545_v44  ;;  %1554 = vst.msk [vmem:[%s4976_s12 + $0x9] sm:$0x1] %vm803_vm2, %v1550_v45  ;;  %v1716_v50 = vrot.slane %v1706_v46, %v4957_v51  ;;  %v4026_v52 = vpop.f32.mrf.mxu1 }
 0x327   : > { %1555 = vst.msk [vmem:[%s4976_s12 + $0x29] sm:$0x1] %vm803_vm2, %v1551_v49  ;;  %v1717_v53 = vcombine.high %v1716_v50, %v1716_v50  ;;  %v1724_v54 = vrot.slane %v1716_v50, %v4957_v51  ;;  %v1816_v55 = vpop.f32.mrf.mxu0 }
 0x328   : > { %v1892_v56 = vadd.f32 %v1891_v47, %v1816_v55 }
 0x329   : > { %v1731_v57 = vrot.slane %v1717_v53, %v4957_v51  ;;  %1734 = vst.msk [vmem:[%s4976_s12 + $0xa] sm:$0x1] %vm803_vm2, %v1724_v54  ;;  %v1736_v7 = vcombine.high %v1724_v54, %v1724_v54  ;;  %v2089_v6 = vpop.f32.mrf.mxu1  ;;  %v4019_v9 = vpop.f32.mrf.mxu0 }
 0x32a   : > { %v1902_v58 = vrot.slane %v1892_v56, %v4957_v51 }
 0x32b   : > { %1735 = vst.msk [vmem:[%s4976_s12 + $0x2a] sm:$0x1] %vm803_vm2, %v1731_v57  ;;  %v1737_v8 = vcombine.high %v1731_v57, %v1731_v57  ;;  %1740 = vst.msk [vmem:[%s4976_s12 + $0xb] sm:$0x1] %vm803_vm2, %v1736_v7  ;;  %v4040_v0 = vpop.f32.mrf.mxu1 }
 0x32c   : > { %v1903_v59 = vcombine.high %v1902_v58, %v1902_v58  ;;  %v1910_v60 = vrot.slane %v1902_v58, %v4957_v51 }
 0x32d   : > { %1741 = vst.msk [vmem:[%s4976_s12 + $0x2b] sm:$0x1] %vm803_vm2, %v1737_v8  ;;  %v2275_v61 = vpop.f32.mrf.mxu1 }
 0x32e   : > { %v1917_v62 = vrot.slane %v1903_v59, %v4957_v51  ;;  %1920 = vst.msk [vmem:[%s4976_s12 + $0xc] sm:$0x1] %vm803_vm2, %v1910_v60  ;;  %v1922_v63 = vcombine.high %v1910_v60, %v1910_v60 }
 0x32f   : > { %v4054_v1 = vpop.f32.mrf.mxu1  ;;  %v2010_v3 = vpop.f32.mrf.mxu0 }
 0x330   : > { %1921 = vst.msk [vmem:[%s4976_s12 + $0x2c] sm:$0x1] %vm803_vm2, %v1917_v62  ;;  %v1923_v2 = vcombine.high %v1917_v62, %v1917_v62  ;;  %1926 = vst.msk [vmem:[%s4976_s12 + $0xd] sm:$0x1] %vm803_vm2, %v1922_v63  ;;  %v2090_v4 = vadd.f32 %v2089_v6, %v2010_v3 }
 0x331   : > { %v4033_v5 = vpop.f32.mrf.mxu0 }
 0x332   : > { %1927 = vst.msk [vmem:[%s4976_s12 + $0x2d] sm:$0x1] %vm803_vm2, %v1923_v2  ;;  %v2100_v10 = vrot.slane %v2090_v4, %v4957_v51 }
 0x334   : > { %v2101_v11 = vcombine.high %v2100_v10, %v2100_v10  ;;  %v2108_v12 = vrot.slane %v2100_v10, %v4957_v51  ;;  %v2461_v13 = vpop.f32.mrf.mxu1 }
 0x335   : > { %v2200_v14 = vpop.f32.mrf.mxu0 }
 0x336   : > { %v2115_v15 = vrot.slane %v2101_v11, %v4957_v51  ;;  %2118 = vst.msk [vmem:[%s4976_s12 + $0xe] sm:$0x1] %vm803_vm2, %v2108_v12  ;;  %v2120_v16 = vcombine.high %v2108_v12, %v2108_v12  ;;  %v2276_v17 = vadd.f32 %v2275_v61, %v2200_v14  ;;  %v4068_v18 = vpop.f32.mrf.mxu1 }
 0x337   : > { %v4047_v19 = vpop.f32.mrf.mxu0 }
 0x338   : > { %2119 = vst.msk [vmem:[%s4976_s12 + $0x2e] sm:$0x1] %vm803_vm2, %v2115_v15  ;;  %v2121_v20 = vcombine.high %v2115_v15, %v2115_v15  ;;  %2124 = vst.msk [vmem:[%s4976_s12 + $0xf] sm:$0x1] %vm803_vm2, %v2120_v16  ;;  %v2286_v21 = vrot.slane %v2276_v17, %v4957_v51 }
 0x33a   : > { %2125 = vst.msk [vmem:[%s4976_s12 + $0x2f] sm:$0x1] %vm803_vm2, %v2121_v20  ;;  %v2287_v22 = vcombine.high %v2286_v21, %v2286_v21  ;;  %v2294_v23 = vrot.slane %v2286_v21, %v4957_v51  ;;  %v2647_v24 = vpop.f32.mrf.mxu1 }
 0x33b   : > { %v2386_v25 = vpop.f32.mrf.mxu0 }
 0x33c   : > { %v2301_v26 = vrot.slane %v2287_v22, %v4957_v51  ;;  %2304 = vst.msk [vmem:[%s4976_s12 + $0x10] sm:$0x1] %vm803_vm2, %v2294_v23  ;;  %v2306_v27 = vcombine.high %v2294_v23, %v2294_v23  ;;  %v2462_v28 = vadd.f32 %v2461_v13, %v2386_v25  ;;  %v4082_v29 = vpop.f32.mrf.mxu1 }
 0x33d   : > { %v4061_v30 = vpop.f32.mrf.mxu0 }
 0x33e   : > { %2305 = vst.msk [vmem:[%s4976_s12 + $0x30] sm:$0x1] %vm803_vm2, %v2301_v26  ;;  %v2307_v31 = vcombine.high %v2301_v26, %v2301_v26  ;;  %2310 = vst.msk [vmem:[%s4976_s12 + $0x11] sm:$0x1] %vm803_vm2, %v2306_v27  ;;  %v2472_v32 = vrot.slane %v2462_v28, %v4957_v51 }
 0x340   : > { %2311 = vst.msk [vmem:[%s4976_s12 + $0x31] sm:$0x1] %vm803_vm2, %v2307_v31  ;;  %v2473_v33 = vcombine.high %v2472_v32, %v2472_v32  ;;  %v2480_v34 = vrot.slane %v2472_v32, %v4957_v51  ;;  %v2833_v35 = vpop.f32.mrf.mxu1 }
 0x341   : > { %v2572_v36 = vpop.f32.mrf.mxu0 }
 0x342   : > { %v2487_v37 = vrot.slane %v2473_v33, %v4957_v51  ;;  %2490 = vst.msk [vmem:[%s4976_s12 + $0x12] sm:$0x1] %vm803_vm2, %v2480_v34  ;;  %v2492_v38 = vcombine.high %v2480_v34, %v2480_v34  ;;  %v2648_v39 = vadd.f32 %v2647_v24, %v2572_v36  ;;  %v4096_v40 = vpop.f32.mrf.mxu1 }
 0x343   : > { %v4075_v41 = vpop.f32.mrf.mxu0 }
 0x344   : > { %2491 = vst.msk [vmem:[%s4976_s12 + $0x32] sm:$0x1] %vm803_vm2, %v2487_v37  ;;  %v2493_v42 = vcombine.high %v2487_v37, %v2487_v37  ;;  %2496 = vst.msk [vmem:[%s4976_s12 + $0x13] sm:$0x1] %vm803_vm2, %v2492_v38  ;;  %v2658_v43 = vrot.slane %v2648_v39, %v4957_v51 }
 0x346   : > { %2497 = vst.msk [vmem:[%s4976_s12 + $0x33] sm:$0x1] %vm803_vm2, %v2493_v42  ;;  %v2659_v44 = vcombine.high %v2658_v43, %v2658_v43  ;;  %v2666_v45 = vrot.slane %v2658_v43, %v4957_v51  ;;  %v3019_v46 = vpop.f32.mrf.mxu1 }
 0x347   : > { %v2758_v47 = vpop.f32.mrf.mxu0 }
 0x348   : > { %v2673_v48 = vrot.slane %v2659_v44, %v4957_v51  ;;  %2676 = vst.msk [vmem:[%s4976_s12 + $0x14] sm:$0x1] %vm803_vm2, %v2666_v45  ;;  %v2678_v49 = vcombine.high %v2666_v45, %v2666_v45  ;;  %v2834_v50 = vadd.f32 %v2833_v35, %v2758_v47  ;;  %v4110_v52 = vpop.f32.mrf.mxu1 }
 0x349   : > { %v4089_v53 = vpop.f32.mrf.mxu0 }
 0x34a   : > { %2677 = vst.msk [vmem:[%s4976_s12 + $0x34] sm:$0x1] %vm803_vm2, %v2673_v48  ;;  %v2679_v54 = vcombine.high %v2673_v48, %v2673_v48  ;;  %2682 = vst.msk [vmem:[%s4976_s12 + $0x15] sm:$0x1] %vm803_vm2, %v2678_v49  ;;  %v2844_v55 = vrot.slane %v2834_v50, %v4957_v51 }
 0x34c   : > { %2683 = vst.msk [vmem:[%s4976_s12 + $0x35] sm:$0x1] %vm803_vm2, %v2679_v54  ;;  %v2845_v56 = vcombine.high %v2844_v55, %v2844_v55  ;;  %v2852_v57 = vrot.slane %v2844_v55, %v4957_v51  ;;  %v3205_v7 = vpop.f32.mrf.mxu1 }
 0x34d   : > { %v2944_v6 = vpop.f32.mrf.mxu0 }
 0x34e   : > { %v3020_v9 = vadd.f32 %v3019_v46, %v2944_v6  ;;  %v2859_v58 = vrot.slane %v2845_v56, %v4957_v51  ;;  %2862 = vst.msk [vmem:[%s4976_s12 + $0x16] sm:$0x1] %vm803_vm2, %v2852_v57  ;;  %v2864_v8 = vcombine.high %v2852_v57, %v2852_v57  ;;  %v4124_v0 = vpop.f32.mrf.mxu1 }
 0x34f   : > { %v4103_v59 = vpop.f32.mrf.mxu0 }
 0x350   : > { %v3030_v60 = vrot.slane %v3020_v9, %v4957_v51  ;;  %2863 = vst.msk [vmem:[%s4976_s12 + $0x36] sm:$0x1] %vm803_vm2, %v2859_v58  ;;  %v2865_v61 = vcombine.high %v2859_v58, %v2859_v58  ;;  %2868 = vst.msk [vmem:[%s4976_s12 + $0x17] sm:$0x1] %vm803_vm2, %v2864_v8 }
 0x351   : > { %v3130_v62 = vpop.f32.mrf.mxu0 }
 0x352   : > { %v3031_v63 = vcombine.high %v3030_v60, %v3030_v60  ;;  %v3038_v1 = vrot.slane %v3030_v60, %v4957_v51  ;;  %v3206_v2 = vadd.f32 %v3205_v7, %v3130_v62  ;;  %2869 = vst.msk [vmem:[%s4976_s12 + $0x37] sm:$0x1] %vm803_vm2, %v2865_v61 }
 0x353   : > { %v4117_v3 = vpop.f32.mrf.mxu0 }
 0x354   : > { %v3045_v4 = vrot.slane %v3031_v63, %v4957_v51  ;;  %3048 = vst.msk [vmem:[%s4976_s12 + $0x18] sm:$0x1] %vm803_vm2, %v3038_v1  ;;  %v3050_v5 = vcombine.high %v3038_v1, %v3038_v1  ;;  %v3216_v10 = vrot.slane %v3206_v2, %v4957_v51 }
 0x356   : > { %3049 = vst.msk [vmem:[%s4976_s12 + $0x38] sm:$0x1] %vm803_vm2, %v3045_v4  ;;  %v3051_v11 = vcombine.high %v3045_v4, %v3045_v4  ;;  %3054 = vst.msk [vmem:[%s4976_s12 + $0x19] sm:$0x1] %vm803_vm2, %v3050_v5  ;;  %v3217_v12 = vcombine.high %v3216_v10, %v3216_v10  ;;  %v3224_v13 = vrot.slane %v3216_v10, %v4957_v51  ;;  %v3324_v14 = vpop.f32.mrf.mxu0  ;;  %v3403_v15 = vpop.f32.mrf.mxu1 }
 0x357   : > { %v3404_v18 = vadd.f32 %v3403_v15, %v3324_v14 }
 0x358   : > { %3055 = vst.msk [vmem:[%s4976_s12 + $0x39] sm:$0x1] %vm803_vm2, %v3051_v11  ;;  %v3231_v16 = vrot.slane %v3217_v12, %v4957_v51  ;;  %3234 = vst.msk [vmem:[%s4976_s12 + $0x1a] sm:$0x1] %vm803_vm2, %v3224_v13  ;;  %v3236_v17 = vcombine.high %v3224_v13, %v3224_v13  ;;  %v4131_v19 = vpop.f32.mrf.mxu0  ;;  %v4138_v20 = vpop.f32.mrf.mxu1 }
 0x359   : > { %v3414_v22 = vrot.slane %v3404_v18, %v4957_v51 }
 0x35a   : > { %3235 = vst.msk [vmem:[%s4976_s12 + $0x3a] sm:$0x1] %vm803_vm2, %v3231_v16  ;;  %v3237_v21 = vcombine.high %v3231_v16, %v3231_v16  ;;  %3240 = vst.msk [vmem:[%s4976_s12 + $0x1b] sm:$0x1] %vm803_vm2, %v3236_v17 }
 0x35b   : > { %v3514_v23 = vpop.f32.mrf.mxu0  ;;  %v3415_v24 = vcombine.high %v3414_v22, %v3414_v22  ;;  %v3422_v25 = vrot.slane %v3414_v22, %v4957_v51  ;;  %v3589_v26 = vpop.f32.mrf.mxu1 }
 0x35c   : > { %3241 = vst.msk [vmem:[%s4976_s12 + $0x3b] sm:$0x1] %vm803_vm2, %v3237_v21  ;;  %v3590_v27 = vadd.f32 %v3589_v26, %v3514_v23 }
 0x35d   : > { %v4145_v28 = vpop.f32.mrf.mxu0  ;;  %v3429_v29 = vrot.slane %v3415_v24, %v4957_v51  ;;  %3432 = vst.msk [vmem:[%s4976_s12 + $0x1c] sm:$0x1] %vm803_vm2, %v3422_v25  ;;  %v3434_v30 = vcombine.high %v3422_v25, %v3422_v25  ;;  %v4152_v31 = vpop.f32.mrf.mxu1 }
 0x35e   : > { %v3600_v32 = vrot.slane %v3590_v27, %v4957_v51 }
 0x35f   : > { %3433 = vst.msk [vmem:[%s4976_s12 + $0x3c] sm:$0x1] %vm803_vm2, %v3429_v29  ;;  %v3435_v33 = vcombine.high %v3429_v29, %v3429_v29  ;;  %3438 = vst.msk [vmem:[%s4976_s12 + $0x1d] sm:$0x1] %vm803_vm2, %v3434_v30 }
 0x360   : > { %v3601_v34 = vcombine.high %v3600_v32, %v3600_v32  ;;  %v3608_v35 = vrot.slane %v3600_v32, %v4957_v51 }
 0x361   : > { %3439 = vst.msk [vmem:[%s4976_s12 + $0x3d] sm:$0x1] %vm803_vm2, %v3435_v33 }
 0x362   : > { %v3615_v36 = vrot.slane %v3601_v34, %v4957_v51  ;;  %3618 = vst.msk [vmem:[%s4976_s12 + $0x1e] sm:$0x1] %vm803_vm2, %v3608_v35  ;;  %v3620_v37 = vcombine.high %v3608_v35, %v3608_v35 }
 0x364   : > { %3619 = vst.msk [vmem:[%s4976_s12 + $0x3e] sm:$0x1] %vm803_vm2, %v3615_v36  ;;  %v3621_v38 = vcombine.high %v3615_v36, %v3615_v36  ;;  %3624 = vst.msk [vmem:[%s4976_s12 + $0x1f] sm:$0x1] %vm803_vm2, %v3620_v37 }
 0x366   : > { %3625 = vst.msk [vmem:[%s4976_s12 + $0x3f] sm:$0x1] %vm803_vm2, %v3621_v38 }
 0x367   : > { %4402 = shalt.err (!%p4399_p2)
}
 0x368   : > { %s4403_s8 = scalar_lea.hbm %s5150_s28, 1024  ;;  %s4407_s2 = scalar_lea.hbm %s5210_s4, 2048 }
 0x369   : > { %p4404_p8 = scmp.ne.s32.totalorder %s5150_s28, %s4403_s8  ;;  %p4408_p10 = scmp.lt.s32.totalorder %s5150_s28, %s5210_s4 }
 0x36a   : > { %p4409_p0 = scmp.lt.s32.totalorder %s4407_s2, %s4403_s8 }
 0x36b   : > { %p4405_p12 = pnand %p4404_p8, %p4637_p13 }
 0x36c   : > { %p4410_p9 = por %p4409_p0, %p4408_p10 }
 0x36d   : > { %p4406_p7 = pneg %p4405_p12 }
 0x36f   : > { %p4411_p1 = pnand %p4410_p9, %p4406_p7 }
 0x371   : > { %4414 = shalt.err (!%p4411_p1)
}
 0x372   : > { %s4510_s27 = smov 128   ;;  %s4511_s12 = smov 8  }
 0x373   : > { %4170 = dma.vmem_to_hbm [thread:$0]  (%p4637_p13), %s5152_s14, 1024, %s5150_s28, %s3627_s18, %s4510_s27, %s4510_s27, %s4511_s12  }
 0x374 PF: > { %s3657_s13 = sand.u32 1, %s4457_s15   ;;  %p5231_p11 = scmp.ne.s32.totalorder %s5220_s26, 0 }
 0x375   : > { %p5232_p6 = scmp.ge.s32.totalorder %s4477_s20, 2  ;;  %s3658_s21 = scalar_lea.sflag [#allocation6], %s3657_s13 }
 0x377   : > { %p4187_p3 = pnand %p5232_p6, %p5231_p11 }
 0x379   : > { %p4188_p5 = pneg %p4187_p3 }
 0x37b   : > { %4452 = dma.done.wait (%p4188_p5), %s3658_s21, 1024  }
 0x37c   : > { %4454 = vsyncadd (%p4188_p5), %s3658_s21, 4294966272  ;;  %s22_s20 = sadd.s32 1, %s4477_s20   ;;  %s5233_s15 = smov %s4461_s16 }
 0x37d   : > { %p19_p4 = scmp.ge.s32.totalorder %s22_s20, 4   ;;  %s5234_s16 = smov %s4465_s17 }
 0x37e   : > { %s5235_s17 = smov %s4653_s24  ;;  %s5236_s18 = smov %s4473_s19 }
 0x37f   : > { %s5237_s19 = smov %s5239_s7  ;;  %21 = sbr.rel (!%p19_p4) target bundleno = 11 (0xb), region = 93 }
 0x384   :  { %3663 = vsyncpa [#allocation5], 1 }
 0x385   :  { %3665 = vsyncpa [#allocation5 + $0x1], 1 }
 0x386   :  { %3666 = vsyncpa [#allocation8], 1 }
 0x387   :  { %3667 = vsyncpa [#allocation11], 1 }
 0x388   :  { %3668 = vsyncpa [#allocation6], 1 }
 0x389   :  { %3670 = vsyncpa [#allocation6 + $0x1], 1 }

</bundles_post_ra>
